<compile_context>
chip_gen: v6e
topology: v6e:2x2x1
jax: 0.10.0
libtpu: 0.0.40
codegen_flags: <defaults>
</compile_context>

<pallas_src>
from typing import List, Optional

import jax
import jax.numpy as jnp
from jax.experimental import pallas as pl
from jax.experimental.pallas import tpu as pltpu


# -----------------------------------------------------------------------------
# Pallas kernel: fused (normalize ∘ 3x3 conv + ReLU ∘ 1x1 conv + sigmoid)
# -----------------------------------------------------------------------------
def _make_det_kernel(tile_h: int, wp: int):
    """Kernel over one (page, row-tile) grid step.

    x_ref block: (1, (tile_h+2)*wp + 8, C) -- the halo'd row tile, flattened
    row-major over padded pixels (mean already subtracted, 1/std folded in w1).
    """
    R = tile_h * wp  # number of output positions in the tile (incl. junk cols)

    def kernel(x_ref, w1_ref, b1_ref, w2_ref, b2_ref, o_ref):
        x = x_ref[0]  # (P2, C) f32

        # Build 3x3 im2col patches in VMEM from 9 shifted static slices of the
        # flat halo tile.  Column ordering is (dy, dx, c) == w1 row ordering.
        slabs = []
        for dy in range(3):
            for dx in range(3):
                start = dy * wp + dx
                slabs.append(x[start:start + R, :])          # (R, C), static slice
        patches = jnp.concatenate(slabs, axis=-1)            # (R, 9*C)

        # 3x3 conv == (R, 27) @ (27, HIDDEN) on the MXU; bf16 in, f32 accumulate.
        h = jnp.dot(patches.astype(jnp.bfloat16),
                    w1_ref[...].astype(jnp.bfloat16),
                    preferred_element_type=jnp.float32)      # (R, HIDDEN) f32
        h = jnp.maximum(h + b1_ref[...], 0.0)                # f32 epilogue (v5e-safe)

        # "1x1 conv" with out-width 1 -> VPU/XLU reduction over HIDDEN instead
        # of a 1-lane matmul; reshape so the store is lane-dense (tile_h, wp).
        hidden = h.shape[-1]
        h3 = h.reshape(tile_h, wp, hidden)
        logits = jnp.sum(h3 * w2_ref[...].reshape(1, 1, hidden), axis=-1)  # (tile_h, wp)
        o_ref[0] = jax.nn.sigmoid(logits + b2_ref[...])

    return kernel


def _round_up(x: int, m: int) -> int:
    return ((x + m - 1) // m) * m


# -----------------------------------------------------------------------------
# Wrapper: data prep (XLA-fused) + pallas_call
# -----------------------------------------------------------------------------
def detection_head_forward(x_nchw, mean, std, params, tile_h: Optional[int] = None):
    """Fused normalize + 3x3 conv + ReLU + 1x1 conv + sigmoid -> (N, H, W) prob maps."""
    N, C, H, W = x_nchw.shape
    hidden = params["w1"].shape[1]

    if tile_h is None:
        tile_h = next((t for t in (128, 64, 32, 16, 8) if H % t == 0), H)
    assert H % tile_h == 0, "tile_h must divide H"
    num_t = H // tile_h

    # Padded row pitch: 1-px conv halo on each side, rounded up to a multiple
    # of 8 so the (tile_h, wp) output block and in-kernel reshape are sublane
    # aligned.  Extra columns produce junk outputs that are sliced off below.
    wp = _round_up(W + 2, 8)
    p2 = (tile_h + 2) * wp + 8  # +8 tail keeps the 9 shifted slices in-bounds

    mean_v = jnp.asarray(mean, jnp.float32).reshape(1, 1, 1, C)
    inv_std = 1.0 / jnp.asarray(std, jnp.float32)                 # (C,)

    # ---- host-side (XLA-fused) prep: NHWC, subtract mean, pad, halo row tiles.
    # Mean is subtracted here (fused into the pad/stack data movement); 1/std is
    # folded into w1 so the zero spatial padding still matches "normalize then
    # zero-pad" exactly.
    xt = jnp.transpose(x_nchw.astype(jnp.float32), (0, 2, 3, 1)) - mean_v    # (N,H,W,C)
    xp = jnp.pad(xt, ((0, 0), (1, 1), (1, wp - W - 1), (0, 0)))              # (N,H+2,wp,C)
    tiles = jnp.stack(
        [xp[:, t * tile_h: t * tile_h + tile_h + 2] for t in range(num_t)], axis=1
    )                                                                        # (N,num_t,tile_h+2,wp,C)
    tiles = tiles.reshape(N * num_t, (tile_h + 2) * wp, C)
    tiles = jnp.pad(tiles, ((0, 0), (0, 8), (0, 0)))                         # (G, p2, C)

    # ---- fold the 1/std normalization into the first conv's weights.
    w1 = params["w1"].astype(jnp.float32)                                    # (9*C, hidden)
    w1 = (w1.reshape(9, C, hidden) * inv_std[None, :, None]).reshape(9 * C, hidden)
    b1 = params["b1"].astype(jnp.float32).reshape(1, hidden)
    w2 = params["w2"].astype(jnp.float32).reshape(1, hidden)                 # row layout
    b2 = params["b2"].astype(jnp.float32).reshape(1, 1)

    G = N * num_t
    out = pl.pallas_call(
        _make_det_kernel(tile_h, wp),
        out_shape=jax.ShapeDtypeStruct((G, tile_h, wp), jnp.float32),
        grid=(G,),
        in_specs=[
            pl.BlockSpec((1, p2, C), lambda i: (i, 0, 0)),        # halo row tile
            pl.BlockSpec((9 * C, hidden), lambda i: (0, 0)),      # w1 (std folded)
            pl.BlockSpec((1, hidden), lambda i: (0, 0)),          # b1
            pl.BlockSpec((1, hidden), lambda i: (0, 0)),          # w2 row
            pl.BlockSpec((1, 1), lambda i: (0, 0)),               # b2
        ],
        out_specs=pl.BlockSpec((1, tile_h, wp), lambda i: (i, 0, 0)),
        compiler_params=pltpu.CompilerParams(
            dimension_semantics=("parallel",),   # pipeline + megacore sharding (v7x)
        ),
    )(tiles, w1, b1, w2, b2)

    # Drop the junk right-pad columns; rows concatenate back into full height.
    return out.reshape(N, H, wp)[:, :, :W]


# -----------------------------------------------------------------------------
# DetectionPredictor (JAX/Pallas version)
# -----------------------------------------------------------------------------
class DetectionPredictor:
    """Localizes text elements: batches pages, runs the fused Pallas detection
    head, returns per-page probability maps."""

    def __init__(self, mean, std, params, tile_h: Optional[int] = None):
        self.mean = tuple(float(m) for m in mean)
        self.std = tuple(float(s) for s in std)
        self.params = params  # w1 (9C, HIDDEN), b1 (1, HIDDEN), w2 (HIDDEN, 1), b2 (1, 1)
        self.tile_h = tile_h

    def __call__(self, pages: List[jnp.ndarray]) -> List[jnp.ndarray]:
        if any(page.ndim != 3 for page in pages):
            raise ValueError(
                "incorrect input shape: all pages are expected to be multi-channel 2D images."
            )
        batch = jnp.stack([jnp.asarray(p, jnp.float32) for p in pages], axis=0)  # (N,C,H,W)
        prob_maps = detection_head_forward(
            batch, self.mean, self.std, self.params, tile_h=self.tile_h
        )
        # TODO(synk): doctr post-processing (binarization + cv2 contour/polygon
        # extraction into box arrays) has no Pallas equivalent; return per-page
        # probability maps as "preds".
        return [prob_maps[i] for i in range(prob_maps.shape[0])]


# -----------------------------------------------------------------------------
# Pure-JAX reference (unfused, f32) for a correctness sanity check
# -----------------------------------------------------------------------------
def _reference_forward(batch, mean, std, params):
    N, C, H, W = batch.shape
    mean = jnp.asarray(mean, jnp.float32).reshape(1, C, 1, 1)
    std = jnp.asarray(std, jnp.float32).reshape(1, C, 1, 1)
    xn = (batch - mean) / std
    x = jnp.transpose(xn, (0, 2, 3, 1))
    xp = jnp.pad(x, ((0, 0), (1, 1), (1, 1), (0, 0)))
    cols = [xp[:, dy:dy + H, dx:dx + W, :] for dy in range(3) for dx in range(3)]
    patches = jnp.concatenate(cols, axis=-1).reshape(N * H * W, 9 * C)
    h = jnp.maximum(patches @ params["w1"] + params["b1"], 0.0)
    logits = h @ params["w2"] + params["b2"]
    return jax.nn.sigmoid(logits).reshape(N, H, W)


# -----------------------------------------------------------------------------
# Main
# -----------------------------------------------------------------------------
if __name__ == "__main__":
    key = jax.random.PRNGKey(0)
    k_pages, k_w1, k_b1, k_w2, k_b2 = jax.random.split(key, 5)

    N, C, H, W = 2, 3, 16, 16
    HIDDEN = 32

    # deterministic synthetic "pages" (CHW, values in [0, 1] like images)
    pages_arr = jax.random.uniform(k_pages, (N, C, H, W), jnp.float32)
    pages = [pages_arr[i] for i in range(N)]

    # deterministic synthetic detection-head parameters
    params = {
        "w1": 0.1 * jax.random.normal(k_w1, (9 * C, HIDDEN), jnp.float32),
        "b1": 0.1 * jax.random.normal(k_b1, (1, HIDDEN), jnp.float32),
        "w2": 0.1 * jax.random.normal(k_w2, (HIDDEN, 1), jnp.float32),
        "b2": 0.1 * jax.random.normal(k_b2, (1, 1), jnp.float32),
    }

    # doctr default normalization stats (db_resnet50)
    mean = (0.798, 0.785, 0.772)
    std = (0.264, 0.2749, 0.287)

    # tile_h=8 -> 2 row tiles per page (exercises the tiled/pipelined grid path)
    predictor = DetectionPredictor(mean, std, params, tile_h=8)
    preds = predictor(pages)
    preds = [jax.block_until_ready(p) for p in preds]

    assert len(preds) == N
    assert all(p.shape == (H, W) for p in preds)

    # sanity check against the unfused f32 reference (bf16 MXU inputs -> loose tol)
    ref = _reference_forward(pages_arr, mean, std, params)
    max_err = float(jnp.max(jnp.abs(jnp.stack(preds) - ref)))
    assert max_err < 2e-2, f"max abs err {max_err}"

    print("KERNEL_OK")
</pallas_src>

<mosaic_0001>
module attributes {stable_mosaic.version = 11 : i64} {
  func.func @kernel(%arg0: i32, %arg1: memref<1x248x3xf32, #tpu.memory_space<vmem>>, %arg2: memref<27x32xf32, #tpu.memory_space<vmem>>, %arg3: memref<1x32xf32, #tpu.memory_space<vmem>>, %arg4: memref<1x32xf32, #tpu.memory_space<vmem>>, %arg5: memref<1x1xf32, #tpu.memory_space<vmem>>, %arg6: memref<1x8x24xf32, #tpu.memory_space<vmem>>) attributes {dimension_semantics = [#tpu.dimension_semantics<parallel>], iteration_bounds = array<i64: 4>, scalar_prefetch = 0 : i64, scratch_operands = 0 : i64, tpu.core_type = #tpu.core_type<tc>, window_params = [{transform_indices = @transform_0, window_bounds = array<i64: 1, 248, 3>}, {pipeline_mode = #tpu.pipeline_mode<synchronous>, transform_indices = @transform_1, window_bounds = array<i64: 27, 32>}, {pipeline_mode = #tpu.pipeline_mode<synchronous>, transform_indices = @transform_2, window_bounds = array<i64: 1, 32>}, {pipeline_mode = #tpu.pipeline_mode<synchronous>, transform_indices = @transform_3, window_bounds = array<i64: 1, 32>}, {pipeline_mode = #tpu.pipeline_mode<synchronous>, transform_indices = @transform_4, window_bounds = array<i64: 1, 1>}, {transform_indices = @transform_5, window_bounds = array<i64: 1, 8, 24>}]} {
    %c0 = arith.constant 0 : index
    %c0_0 = arith.constant 0 : index
    %c0_1 = arith.constant 0 : index
    %0 = vector.load %arg1[%c0, %c0_0, %c0_1] : memref<1x248x3xf32, #tpu.memory_space<vmem>>, vector<1x248x3xf32>
    %1 = vector.shape_cast %0 : vector<1x248x3xf32> to vector<248x3xf32>
    %2 = vector.extract_strided_slice %1 {offsets = [0, 0], sizes = [192, 3], strides = [1, 1]} : vector<248x3xf32> to vector<192x3xf32>
    %3 = vector.extract_strided_slice %1 {offsets = [1, 0], sizes = [192, 3], strides = [1, 1]} : vector<248x3xf32> to vector<192x3xf32>
    %4 = vector.extract_strided_slice %1 {offsets = [2, 0], sizes = [192, 3], strides = [1, 1]} : vector<248x3xf32> to vector<192x3xf32>
    %5 = vector.extract_strided_slice %1 {offsets = [24, 0], sizes = [192, 3], strides = [1, 1]} : vector<248x3xf32> to vector<192x3xf32>
    %6 = vector.extract_strided_slice %1 {offsets = [25, 0], sizes = [192, 3], strides = [1, 1]} : vector<248x3xf32> to vector<192x3xf32>
    %7 = vector.extract_strided_slice %1 {offsets = [26, 0], sizes = [192, 3], strides = [1, 1]} : vector<248x3xf32> to vector<192x3xf32>
    %8 = vector.extract_strided_slice %1 {offsets = [48, 0], sizes = [192, 3], strides = [1, 1]} : vector<248x3xf32> to vector<192x3xf32>
    %9 = vector.extract_strided_slice %1 {offsets = [49, 0], sizes = [192, 3], strides = [1, 1]} : vector<248x3xf32> to vector<192x3xf32>
    %10 = vector.extract_strided_slice %1 {offsets = [50, 0], sizes = [192, 3], strides = [1, 1]} : vector<248x3xf32> to vector<192x3xf32>
    %11 = tpu.concatenate %2, %3, %4, %5, %6, %7, %8, %9, %10 in 1 : vector<192x3xf32>, vector<192x3xf32>, vector<192x3xf32>, vector<192x3xf32>, vector<192x3xf32>, vector<192x3xf32>, vector<192x3xf32>, vector<192x3xf32>, vector<192x3xf32> -> vector<192x27xf32>
    %12 = arith.truncf %11 : vector<192x27xf32> to vector<192x27xbf16>
    %c0_2 = arith.constant 0 : index
    %c0_3 = arith.constant 0 : index
    %13 = vector.load %arg2[%c0_2, %c0_3] : memref<27x32xf32, #tpu.memory_space<vmem>>, vector<27x32xf32>
    %14 = arith.truncf %13 : vector<27x32xf32> to vector<27x32xbf16>
    %cst = arith.constant dense<0.000000e+00> : vector<192x32xf32>
    %15 = tpu.matmul %12, %14, %cst {dimension_numbers = #tpu.dot_dimension_numbers<[1], [0], [0], [1], [0, 0, 1, 1], [], []>} : vector<192x27xbf16>, vector<27x32xbf16>, vector<192x32xf32> -> vector<192x32xf32>
    %c0_4 = arith.constant 0 : index
    %c0_5 = arith.constant 0 : index
    %16 = vector.load %arg3[%c0_4, %c0_5] : memref<1x32xf32, #tpu.memory_space<vmem>>, vector<1x32xf32>
    %17 = vector.broadcast %16 : vector<1x32xf32> to vector<192x32xf32>
    %18 = arith.addf %15, %17 : vector<192x32xf32>
    %cst_6 = arith.constant 0.000000e+00 : f32
    %19 = vector.broadcast %cst_6 : f32 to vector<192x32xf32>
    %20 = arith.maximumf %18, %19 : vector<192x32xf32>
    %21 = vector.shape_cast %20 : vector<192x32xf32> to vector<8x24x32xf32>
    %c0_7 = arith.constant 0 : index
    %c0_8 = arith.constant 0 : index
    %22 = vector.load %arg4[%c0_7, %c0_8] : memref<1x32xf32, #tpu.memory_space<vmem>>, vector<1x32xf32>
    %23 = vector.shape_cast %22 : vector<1x32xf32> to vector<1x1x32xf32>
    %24 = vector.broadcast %23 : vector<1x1x32xf32> to vector<8x24x32xf32>
    %25 = arith.mulf %21, %24 : vector<8x24x32xf32>
    %cst_9 = arith.constant dense<0.000000e+00> : vector<8x24xf32>
    %26 = vector.multi_reduction <add>, %25, %cst_9 [2] : vector<8x24x32xf32> to vector<8x24xf32>
    %c0_10 = arith.constant 0 : index
    %c0_11 = arith.constant 0 : index
    %27 = vector.load %arg5[%c0_10, %c0_11] : memref<1x1xf32, #tpu.memory_space<vmem>>, vector<1x1xf32>
    %28 = vector.broadcast %27 : vector<1x1xf32> to vector<8x24xf32>
    %29 = arith.addf %26, %28 : vector<8x24xf32>
    %30 = arith.negf %29 : vector<8x24xf32>
    %31 = math.exp %30 : vector<8x24xf32>
    %cst_12 = arith.constant 1.000000e+00 : f32
    %32 = vector.broadcast %cst_12 : f32 to vector<8x24xf32>
    %33 = arith.addf %32, %31 : vector<8x24xf32>
    %34 = arith.divf %32, %33 : vector<8x24xf32>
    %c0_13 = arith.constant 0 : index
    %c0_14 = arith.constant 0 : index
    %c0_15 = arith.constant 0 : index
    %35 = vector.load %arg6[%c0_13, %c0_14, %c0_15] : memref<1x8x24xf32, #tpu.memory_space<vmem>>, vector<1x8x24xf32>
    %36 = vector.shape_cast %35 : vector<1x8x24xf32> to vector<8x24xf32>
    %37 = vector.shape_cast %34 : vector<8x24xf32> to vector<1x8x24xf32>
    tpu.vector_store %arg6[%c0_13, %c0_14, %c0_15], %37 {strides = array<i32>} : memref<1x8x24xf32, #tpu.memory_space<vmem>>, vector<1x8x24xf32>,
    return
  }
  func.func @transform_0(%arg0: i32) -> (i32, i32, i32) {
    %c0_i32 = arith.constant 0 : i32
    %c0_i32_0 = arith.constant 0 : i32
    %c0_i32_1 = arith.constant 0 : i32
    return %arg0, %c0_i32, %c0_i32_0 : i32, i32, i32
  }
  func.func @transform_1(%arg0: i32) -> (i32, i32) {
    %c0_i32 = arith.constant 0 : i32
    %c0_i32_0 = arith.constant 0 : i32
    %c0_i32_1 = arith.constant 0 : i32
    return %c0_i32, %c0_i32_0 : i32, i32
  }
  func.func @transform_2(%arg0: i32) -> (i32, i32) {
    %c0_i32 = arith.constant 0 : i32
    %c0_i32_0 = arith.constant 0 : i32
    %c0_i32_1 = arith.constant 0 : i32
    return %c0_i32, %c0_i32_0 : i32, i32
  }
  func.func @transform_3(%arg0: i32) -> (i32, i32) {
    %c0_i32 = arith.constant 0 : i32
    %c0_i32_0 = arith.constant 0 : i32
    %c0_i32_1 = arith.constant 0 : i32
    return %c0_i32, %c0_i32_0 : i32, i32
  }
  func.func @transform_4(%arg0: i32) -> (i32, i32) {
    %c0_i32 = arith.constant 0 : i32
    %c0_i32_0 = arith.constant 0 : i32
    %c0_i32_1 = arith.constant 0 : i32
    return %c0_i32, %c0_i32_0 : i32, i32
  }
  func.func @transform_5(%arg0: i32) -> (i32, i32, i32) {
    %c0_i32 = arith.constant 0 : i32
    %c0_i32_0 = arith.constant 0 : i32
    %c0_i32_1 = arith.constant 0 : i32
    return %arg0, %c0_i32, %c0_i32_0 : i32, i32, i32
  }
}

</mosaic_0001>

<bundles_post_ra>
// kernel: tpu_custom_call.1
= control target key start
LH: loop header
LB: loop body
LE: loop exit
PB: predicated region body
PF: predicated region fallthrough
CT: control target
= control target key end

     0   :  { %s4214_s0 = inlined_call_operand.vmem [shape: f32[4,248,3], index: 0, kind: input, shape index: {}]   ;;  %s4215_s1 = inlined_call_operand.vmem [shape: f32[27,32], index: 1, kind: input, shape index: {}]   ;;  %s4216_s2 = inlined_call_operand.vmem [shape: f32[1,32], index: 2, kind: input, shape index: {}]   ;;  %s4217_s3 = inlined_call_operand.vmem [shape: f32[1,32], index: 3, kind: input, shape index: {}]   ;;  %s4218_s4 = inlined_call_operand.<no memory space> [shape: f32[1,1], index: 4, kind: input, shape index: {}]   ;;  %s4219_s5 = inlined_call_operand.hbm [shape: f32[4,8,24], index: 5, kind: output, shape index: {}]  }
   0x1   :  { %v10_v0 = vstv %s4218_s4 }
   0x2   :  { %11 = vst [vmem:[#allocation2] sm:$0x1] %v10_v0 }
   0x3   :  { %12 = vsyncpa [#allocation4], 0 }
   0x4   :  { %14 = vsyncpa [#allocation4 + $0x1], 0  ;;  %s2766_s20 = smov 0   ;;  %s2768_s21 = smov 0  }
   0x5   :  { %s2770_s22 = smov 0   ;;  %s2772_s23 = smov 0  }
   0x6 LB: > { %s2787_s4 = sadd.s32 4294967295, %s2720_s23   ;;  %s1922_s24 = sadd.s32 4294967294, %s2720_s23   ;;  %s2720_s23 = sphi %s2772_s23, %s4361_s23   ;;  %s2716_s22 = sphi %s2770_s22, %s4360_s22   ;;  %s2712_s21 = sphi %s2768_s21, %s4359_s21   ;;  %s2708_s20 = sphi %s2766_s20, %s4358_s20  }
   0x7   : > { %s2791_s25 = sadd.s32 1, %s2720_s23   ;;  %s137_s26 = sadd.s32 1, %s2716_s22 }
   0x8   : > { %s134_s27 = ssub.s32 %s2720_s23, %s2791_s25  ;;  %p147_p0 = scmp.ne.s32.totalorder %s2716_s22, %s2712_s21 }
   0x9   : > { %p135_p1 = scmp.eq.s32.totalorder %s134_s27, 0  ;;  %p148_p2 = scmp.eq.s32.totalorder %s2787_s4, 3 }
   0xa   : > { %p153_p3 = scmp.ne.s32.totalorder %s2712_s21, %s2708_s20  ;;  %p154_p4 = scmp.eq.s32.totalorder %s1922_s24, 3 }
   0xb   : > { %s2802_s28 = scalar_select %p135_p1, %s2716_s22, %s137_s26  }
   0xc   : > { %p2804_p5 = por %p148_p2, %p147_p0  ;;  %p2808_p6 = por %p154_p4, %p153_p3 }
   0xd   : > { %p1925_p7 = scmp.ge.s32.totalorder %s2720_s23, 1  ;;  %p192_p8 = scmp.lt.s32.totalorder %s2720_s23, 5 }
   0xf   : > { %p193_p9 = pnand %p1925_p7, %p192_p8 }
  0x11   : > { %196 = sbr.rel (%p193_p9) target bundleno = 778 (0x30a), region = 40 }
  0x16   : > { %p220_p10 = scmp.lt.s32.totalorder %s2787_s4, 3  ;;  %vm282_vm0 = vcmask 1046528   ;;  %s2722_s11 = smov 3   ;;  %vm404_vm1 = vcmask 1045504   ;;  %vm1250_vm2 = vcmask 1044480   ;;  %vm988_vm3 = vcmask 23552  }
  0x17   : > { %s2723_s12 = smov 6   ;;  %s2724_s13 = smov 9   ;;  %vm1013_vm4 = vcmask 48128   ;;  %vm1038_vm5 = vcmask 72704   ;;  %vm1063_vm6 = vcmask 97280   ;;  %vm1088_vm7 = vcmask 121856  }
  0x18   : > { %s221_s6 = scalar_select %p220_p10, %s2787_s4, 3  ;;  %vm1113_vm8 = vcmask 146432   ;;  %vm1138_vm9 = vcmask 171008   ;;  %vm1163_vm10 = vcmask 195584   ;;  %vm1213_vm11 = vcmask 220160  }
  0x19   : > { %s2725_s14 = smov 12   ;;  %s2726_s15 = smov 15   ;;  %vm1440_vm12 = vcmask 261120   ;;  %vm1726_vm13 = vcmask 130112   ;;  %vm1733_vm14 = vcmask 195712   ;;  %vm1833_vm15 = vcmask 1041409  }
  0x1a   : > { %s2017_s7 = smul.u32 248, %s221_s6  ;;  %s2727_s24 = smov 18  }
  0x1b   : > { %s2729_s8 = smov 21   ;;  %s2730_s9 = smov 24  }
  0x1c   : > { %s2819_s10 = scalar_lea.vmem %s4214_s0, %s2017_s7  ;;  %s1968_s16 = sshll.u32 %s2787_s4, 7 }
  0x1d   : > { %v2822_v1 = vld [vmem:[%s2819_s10 + $0x28] sm:$0xff]  ;;  %v2825_v2 = vld [vmem:[%s2819_s10 + $0x30] sm:$0xff]  ;;  %v2828_v3 = vld [vmem:[%s2819_s10 + $0x38] sm:$0xff]  ;;  %s4176_s26 = scalar_lea.hbm %s4219_s5, %s1968_s16  ;;  %s2732_s6 = smov [#allocation3]  }
  0x1e   : > { %v292_v4 = vrot.slane %v2822_v1, 1  ;;  %v294_v5 = vrot.slane %v2825_v2, 1  ;;  %v296_v6 = vrot.slane %v2828_v3, 1  ;;  %v2834_v7 = vld [vmem:[%s2819_s10 + $0x20] sm:$0xff]  ;;  %v2837_v8 = vld [vmem:[%s2819_s10 + $0x18] sm:$0xff]  ;;  %v2845_v12 = vld [vmem:[%s2819_s10 + $0x8] sm:$0xff] }
  0x1f   : > { %4266 = vst [vmem:[#allocation6_spill] sm:$0xff] %v2837_v8  ;;  %v2840_v9 = vld [vmem:[%s2819_s10] sm:$0xff]  ;;  %v290_v10 = vrot.slane %v2834_v7, 1  ;;  %v288_v11 = vrot.slane %v2837_v8, 1  ;;  %4268 = vst [vmem:[#allocation8_spill] sm:$0xff] %v2845_v12  ;;  %v2848_v13 = vld [vmem:[%s2819_s10 + $0x10] sm:$0xff] }
  0x20   : > { %4267 = vst [vmem:[#allocation7_spill] sm:$0xff] %v2840_v9  ;;  %4269 = vst [vmem:[#allocation9_spill] sm:$0xff] %v2848_v13  ;;  %v283_v14 = vrot.slane %v2840_v9, 1  ;;  %v2852_v15 = vld [vmem:[%s2819_s10 + $0x40] sm:$0xff]  ;;  %v2855_v16 = vsel %vm282_vm0, %v292_v4, %v294_v5  ;;  %v284_v17 = vrot.slane %v2845_v12, 1  ;;  %v286_v18 = vrot.slane %v2848_v13, 1 }
  0x21   : > { %v2860_v19 = vld [vmem:[%s2819_s10 + $0x50] sm:$0xff]  ;;  %v2863_v20 = vsel %vm282_vm0, %v294_v5, %v296_v6  ;;  %v2866_v21 = vsel %vm282_vm0, %v290_v10, %v292_v4  ;;  %v2869_v22 = vsel %vm282_vm0, %v288_v11, %v290_v10  ;;  %v298_v23 = vrot.slane %v2852_v15, 1  ;;  %v2873_v24 = vld [vmem:[%s2819_s10 + $0x58] sm:$0xff]  ;;  %v2876_v25 = vld [vmem:[%s2819_s10 + $0x60] sm:$0xff]  ;;  %s2664_s7 = sshll.u32 %s2732_s6, 4  ;;  %s2665_s7 = int_to_ptr.vmem [resolvable:$false] %s2664_s7 }
  0x22   : > { %v2879_v26 = vld [vmem:[%s2819_s10 + $0x48] sm:$0xff]  ;;  %v2077_v27 = vpack.i.bf16 %v2855_v16, %v2866_v21  ;;  %v285_v28 = vsel %vm282_vm0, %v283_v14, %v284_v17  ;;  %v287_v29 = vsel %vm282_vm0, %v284_v17, %v286_v18  ;;  %v2886_v30 = vld [vmem:[%s2819_s10 + $0x70] sm:$0xff]  ;;  %v2889_v31 = vld [vmem:[%s2819_s10 + $0x78] sm:$0xff]  ;;  %v289_v35 = vsel %vm282_vm0, %v286_v18, %v288_v11 }
  0x23   : > { %4270 = vst [vmem:[#allocation10_spill] sm:$0xff] %v2886_v30  ;;  %v2892_v32 = vld [vmem:[%s2819_s10 + $0x80] sm:$0xff]  ;;  %v2067_v33 = vpack.i.bf16 %v287_v29, %v285_v28  ;;  %v2895_v34 = vsel %vm282_vm0, %v296_v6, %v298_v23  ;;  %v302_v36 = vrot.slane %v2860_v19, 1  ;;  %v2900_v37 = vld [vmem:[%s2819_s10 + $0x68] sm:$0xff]  ;;  %v2072_v39 = vpack.i.bf16 %v2869_v22, %v289_v35  ;;  %v2911_v42 = vld [vmem:[%s2819_s10 + $0x90] sm:$0xff] }
  0x24   : > { %4271 = vst [vmem:[#allocation11_spill] sm:$0xff] %v2892_v32  ;;  %2078 = vrot.lane.b32.xlu1 %v2077_v27, %s2722_s11  ;;  %v2905_v38 = vpack.i.bf16 %v2895_v34, %v2863_v20  ;;  %v304_v40 = vrot.slane %v2873_v24, 1  ;;  %v306_v41 = vrot.slane %v2876_v25, 1  ;;  %v300_v43 = vrot.slane %v2879_v26, 1  ;;  %v2926_v50 = vld [vmem:[%s2819_s10 + $0x98] sm:$0xff]  ;;  %v2929_v51 = vld [vmem:[%s2819_s10 + $0xa0] sm:$0xff] }
  0x25   : > { %2068 = vrot.lane.b32.xlu0 %v2067_v33, %s2722_s11  ;;  %v310_v44 = vrot.slane %v2886_v30, 1  ;;  %v312_v45 = vrot.slane %v2889_v31, 1  ;;  %v314_v46 = vrot.slane %v2892_v32, 1  ;;  %v308_v49 = vrot.slane %v2900_v37, 1  ;;  %v2943_v56 = vld [vmem:[%s2819_s10 + $0x88] sm:$0xff]  ;;  %v2967_v0 = vld [vmem:[%s2819_s10 + $0xb0] sm:$0xff] }
  0x26   : > { %v2919_v47 = vsel %vm282_vm0, %v302_v36, %v304_v40  ;;  %v2922_v48 = vsel %vm282_vm0, %v304_v40, %v306_v41  ;;  %v2936_v53 = vsel %vm282_vm0, %v298_v23, %v300_v43  ;;  %v2939_v54 = vsel %vm282_vm0, %v300_v43, %v302_v36  ;;  %4274 = vst [vmem:[#allocation14_spill] sm:$0xff] %v2943_v56  ;;  %v2970_v4 = vld [vmem:[%s2819_s10 + $0xb8] sm:$0xff]  ;;  %v2973_v5 = vld [vmem:[%s2819_s10 + $0xc0] sm:$0xff]  ;;  %v2977_v10 = vld [vmem:[%s2819_s10 + $0xa8] sm:$0xff] }
  0x27   : > { %4272 = vst [vmem:[#allocation12_spill] sm:$0xff] %v2922_v48  ;;  %v2933_v52 = vpack.i.bf16 %v2922_v48, %v2919_v47  ;;  %v318_v55 = vrot.slane %v2911_v42, 1  ;;  %v2948_v57 = vsel %vm282_vm0, %v310_v44, %v312_v45  ;;  %v2951_v58 = vsel %vm282_vm0, %v312_v45, %v314_v46  ;;  %4278 = vst [vmem:[#allocation18_spill] sm:$0xff] %v2970_v4 }
  0x28   : > { %2083 = vrot.lane.b32.xlu1 %v2905_v38, %s2722_s11  ;;  %4275 = vst [vmem:[#allocation15_spill] sm:$0xff] %v2948_v57  ;;  %v2954_v59 = vsel %vm282_vm0, %v306_v41, %v308_v49  ;;  %v2957_v60 = vsel %vm282_vm0, %v308_v49, %v310_v44  ;;  %v2962_v61 = vpack.i.bf16 %v2939_v54, %v2936_v53  ;;  %v320_v62 = vrot.slane %v2926_v50, 1 }
  0x29   : > { %4273 = vst [vmem:[#allocation13_spill] sm:$0xff] %v2933_v52  ;;  %4276 = vst [vmem:[#allocation16_spill] sm:$0xff] %v2954_v59  ;;  %2073 = vrot.lane.b32.xlu0 %v2072_v39, %s2722_s11  ;;  %v322_v63 = vrot.slane %v2929_v51, 1  ;;  %v316_v6 = vrot.slane %v2943_v56, 1  ;;  %v2981_v11 = vpack.i.bf16 %v2951_v58, %v2948_v57  ;;  %v2985_v14 = vpack.i.bf16 %v2957_v60, %v2954_v59 }
  0x2a   : > { %4277 = vst [vmem:[#allocation17_spill] sm:$0xff] %v2957_v60  ;;  %v2990_v17 = vsel %vm282_vm0, %v318_v55, %v320_v62  ;;  %v326_v18 = vrot.slane %v2967_v0, 1  ;;  %v328_v23 = vrot.slane %v2970_v4, 1  ;;  %v4220_v27 = vrot.slane %v2973_v5, 1 }
  0x2b   : > { %4279 = vst [vmem:[#allocation19_spill] sm:$0xff] %v2981_v11  ;;  %4280 = vst [vmem:[#allocation20_spill] sm:$0xff] %v2985_v14  ;;  %v2998_v28 = vsel %vm282_vm0, %v320_v62, %v322_v63  ;;  %v3001_v29 = vsel %vm282_vm0, %v314_v46, %v316_v6  ;;  %v3004_v33 = vsel %vm282_vm0, %v316_v6, %v318_v55  ;;  %v324_v35 = vrot.slane %v2977_v10, 1 }
  0x2c   : > { %2093 = vrot.lane.b32.xlu1 %v2933_v52, %s2722_s11  ;;  %v408_v36 = vrot.slane %v2848_v13, 2  ;;  %v3012_v39 = vpack.i.bf16 %v2998_v28, %v2990_v17  ;;  %v3016_v40 = vpack.i.bf16 %v3004_v33, %v3001_v29  ;;  %v3019_v41 = vsel %vm282_vm0, %v326_v18, %v328_v23 }
  0x2d   : > { %2088 = vrot.lane.b32.xlu0 %v2962_v61, %s2722_s11  ;;  %v3024_v43 = vsel %vm282_vm0, %v328_v23, %v4220_v27  ;;  %v3029_v44 = vsel %vm282_vm0, %v322_v63, %v324_v35  ;;  %v3032_v45 = vsel %vm282_vm0, %v324_v35, %v326_v18  ;;  %v410_v46 = vrot.slane %v2837_v8, 2 }
  0x2e   : > { %4281 = vst [vmem:[#allocation21_spill] sm:$0xff] %v3012_v39  ;;  %4282 = vst [vmem:[#allocation22_spill] sm:$0xff] %v3016_v40  ;;  %v412_v49 = vrot.slane %v2834_v7, 2  ;;  %v405_v55 = vrot.slane %v2840_v9, 2  ;;  %v406_v62 = vrot.slane %v2845_v12, 2  ;;  %v3042_v6 = vpack.i.bf16 %v3024_v43, %v3019_v41 }
  0x2f   : > { %4283 = vst [vmem:[#allocation23_spill] sm:$0xff] %v3024_v43  ;;  %v3046_v63 = vpack.i.bf16 %v3032_v45, %v3029_v44  ;;  %v416_v18 = vrot.slane %v2825_v2, 2  ;;  %v418_v23 = vrot.slane %v2828_v3, 2  ;;  %v411_v35 = vsel %vm404_vm1, %v408_v36, %v410_v46 }
  0x30   : > { %2103 = vrot.lane.b32.xlu1 %v2981_v11, %s2722_s11  ;;  %4284 = vst [vmem:[#allocation24_spill] sm:$0xff] %v3042_v6  ;;  %v3054_v27 = vsel %vm404_vm1, %v410_v46, %v412_v49  ;;  %v420_v12 = vrot.slane %v2852_v15, 2  ;;  %v414_v13 = vrot.slane %v2822_v1, 2  ;;  %v407_v9 = vsel %vm404_vm1, %v405_v55, %v406_v62 }
  0x31   : > { %2098 = vrot.lane.b32.xlu0 %v2985_v14, %s2722_s11  ;;  %v409_v11 = vsel %vm404_vm1, %v406_v62, %v408_v36  ;;  %v2132_v14 = vpack.i.bf16 %v3054_v27, %v411_v35  ;;  %v3066_v46 = vsel %vm404_vm1, %v416_v18, %v418_v23  ;;  %v4229_v55 = vrot.slane %v2879_v26, 2 }
  0x32   : > { %v3069_v52 = vsel %vm404_vm1, %v418_v23, %v420_v12  ;;  %v3075_v36 = vsel %vm404_vm1, %v414_v13, %v416_v18  ;;  %v428_v62 = vrot.slane %v2876_v25, 2  ;;  %v430_v35 = vrot.slane %v2900_v37, 2 }
  0x33   : > { %v432_v18 = vrot.slane %v2886_v30, 2  ;;  %v2152_v23 = vpack.i.bf16 %v2834_v7, %v2837_v8  ;;  %v2157_v30 = vpack.i.bf16 %v2825_v2, %v2822_v1  ;;  %v3122_v8 = vld [vmem:[%s2819_s10 + $0xc8] sm:$0xff]  ;;  %v4289_v59 = vrot.slane %v2973_v5, 1 }
  0x34   : > { %2113 = vrot.lane.b32.xlu1 %v3012_v39, %s2722_s11  ;;  %v3072_v39 = vsel %vm404_vm1, %v412_v49, %v414_v13  ;;  %v3093_v49 = vsel %vm404_vm1, %v420_v12, %v4229_v55  ;;  %v426_v13 = vrot.slane %v2873_v24, 2  ;;  %v2167_v55 = vpack.i.bf16 %v2863_v20, %v2855_v16 }
  0x35   : > { %2108 = vrot.lane.b32.xlu0 %v3016_v40, %s2722_s11  ;;  %v2127_v40 = vpack.i.bf16 %v409_v11, %v407_v9  ;;  %v3083_v9 = vpack.i.bf16 %v3069_v52, %v3066_v46  ;;  %v2137_v11 = vpack.i.bf16 %v3075_v36, %v3072_v39  ;;  %v2162_v16 = vpack.i.bf16 %v2866_v21, %v2869_v22 }
  0x36   : > { %v3133_v20 = vsel %vm404_vm1, %v426_v13, %v428_v62  ;;  %v450_v22 = vrot.slane %v2970_v4, 2  ;;  %v2172_v7 = vpack.i.bf16 %v3072_v39, %v3054_v27  ;;  %v438_v4 = vrot.slane %v2943_v56, 2 }
  0x38   : > { %2123 = vrot.lane.b32.xlu1 %v3042_v6, %s2722_s11  ;;  %v4234_v6 = vrot.slane %v2860_v19, 2 }
  0x39   : > { %2118 = vrot.lane.b32.xlu0 %v3046_v63, %s2722_s11 }
  0x3a   : > { %v3130_v1 = vsel %vm404_vm1, %v4234_v6, %v426_v13  ;;  %v452_v6 = vrot.slane %v2973_v5, 2  ;;  %v679_v13 = vrot.slane %v3122_v8, 2 }
  0x3b   : > { %v3141_v21 = vpack.i.bf16 %v3133_v20, %v3130_v1 }
  0x3c   : > { %2133 = vrot.lane.b32.xlu1 %v2132_v14, %s2723_s12  ;;  %v3096_v14 = vsel %vm404_vm1, %v428_v62, %v430_v35 }
  0x3d   : > { %2128 = vrot.lane.b32.xlu0 %v2127_v40, %s2723_s12  ;;  %v2147_v12 = vpack.i.bf16 %v3096_v14, %v3093_v49  ;;  %v3114_v40 = vsel %vm404_vm1, %v430_v35, %v432_v18  ;;  %4285 = vst [vmem:[#allocation25_spill] sm:$0xff] %v3141_v21  ;;  %v4240_v35 = vrot.slane %v2967_v0, 2  ;;  %v601_v21 = vrot.slane %v3122_v8, 1 }
  0x3f   : > { %v3171_v48 = vsel %vm404_vm1, %v4240_v35, %v450_v22  ;;  %v3179_v39 = vsel %vm282_vm0, %v4289_v59, %v601_v21 }
  0x40   : > { %2143 = vrot.lane.b32.xlu1 %v3083_v9, %s2723_s12 }
  0x41   : > { %2138 = vrot.lane.b32.xlu0 %v2137_v11, %s2723_s12  ;;  %v434_v11 = vrot.slane %v2889_v31, 2 }
  0x43   : > { %v3166_v62 = vsel %vm404_vm1, %v432_v18, %v434_v11 }
  0x44   : > { %2153 = vrot.lane.b32.xlu1 %v2152_v23, %s2724_s13  ;;  %v3145_v23 = vld [vmem:[%s2819_s10 + $0xd0] sm:$0xff]  ;;  %4287 = vst [vmem:[#allocation27_spill] sm:$0xff] %v3166_v62  ;;  %v3196_v59 = vpack.i.bf16 %v3166_v62, %v3114_v40  ;;  %v3267_v62 = vld [vmem:[%s2819_s10 + $0xe0] sm:$0xff] }
  0x45   : > { %2148 = vrot.lane.b32.xlu0 %v2147_v12, %s2723_s12  ;;  %4286 = vst [vmem:[#allocation26_spill] sm:$0xff] %v3145_v23  ;;  %v436_v12 = vrot.slane %v2892_v32, 2  ;;  %v603_v27 = vrot.slane %v3145_v23, 1  ;;  %v681_v35 = vrot.slane %v3145_v23, 2  ;;  %v3206_v23 = vsel %vm404_vm1, %v452_v6, %v679_v13  ;;  %4296 = vst [vmem:[#allocation35_spill] sm:$0xff] %v3267_v62 }
  0x46   : > { %4290 = vst [vmem:[#allocation29_spill] sm:$0xff] %v3196_v59  ;;  %4293 = vst [vmem:[#allocation32_spill] sm:$0xff] %v3206_v23  ;;  %v2212_v23 = vpack.i.bf16 %v2911_v42, %v2943_v56 }
  0x47   : > { %v3186_v18 = vsel %vm282_vm0, %v601_v21, %v603_v27  ;;  %v3200_v21 = vsel %vm404_vm1, %v434_v11, %v436_v12  ;;  %v3203_v57 = vsel %vm404_vm1, %v436_v12, %v438_v4  ;;  %v2187_v11 = vpack.i.bf16 %v2828_v3, %v2825_v2 }
  0x48   : > { %2163 = vrot.lane.b32.xlu1 %v2162_v16, %s2725_s14  ;;  %v3174_v16 = vsel %vm404_vm1, %v450_v22, %v452_v6  ;;  %v2182_v22 = vpack.i.bf16 %v3066_v46, %v3075_v36  ;;  %4291 = vst [vmem:[#allocation30_spill] sm:$0xff] %v3200_v21  ;;  %4292 = vst [vmem:[#allocation31_spill] sm:$0xff] %v3203_v57  ;;  %v3209_v46 = vsel %vm404_vm1, %v679_v13, %v681_v35  ;;  %v3212_v36 = vld [vmem:[%s2819_s10 + $0xd8] sm:$0xff] }
  0x49   : > { %2158 = vrot.lane.b32.xlu0 %v2157_v30, %s2724_s13  ;;  %4288 = vst [vmem:[#allocation28_spill] sm:$0xff] %v3174_v16  ;;  %v3183_v30 = vpack.i.bf16 %v3174_v16, %v3171_v48  ;;  %4294 = vst [vmem:[#allocation33_spill] sm:$0xff] %v3209_v46  ;;  %v605_v13 = vrot.slane %v3212_v36, 1  ;;  %v683_v60 = vrot.slane %v3212_v36, 2  ;;  %v2197_v2 = vpack.i.bf16 %v2892_v32, %v2889_v31 }
  0x4a   : > { %4295 = vst [vmem:[#allocation34_spill] sm:$0xff] %v3212_v36  ;;  %v832_v32 = vrot.slane %v3267_v62, 1 }
  0x4b   : > { %v3236_v12 = vsel %vm282_vm0, %v603_v27, %v605_v13  ;;  %v3246_v16 = vsel %vm404_vm1, %v681_v35, %v683_v60  ;;  %v1202_v27 = vld [vmem:[%s4215_s1 + $0x10] sm:$0xff]  ;;  %v1203_v35 = vld [vmem:[%s4215_s1 + $0x18] sm:$0x7] }
  0x4c   : > { %2173 = vrot.lane.b32.xlu1 %v2172_v7, %s2726_s15  ;;  %v4247_v7 = vrot.slane %v2911_v42, 2  ;;  %v1205_v36 = vpack.c.bf16 %v1203_v35, %v1202_v27 }
  0x4d   : > { %2168 = vrot.lane.b32.xlu0 %v2167_v55, %s2725_s14  ;;  %v3228_v55 = vpack.i.bf16 %v3203_v57, %v3200_v21  ;;  %v3270_v21 = vld [vmem:[%s2819_s10 + $0xe8] sm:$0xff] }
  0x4e   : > { %v3241_v6 = vsel %vm404_vm1, %v438_v4, %v4247_v7  ;;  %v2202_v4 = vpack.i.bf16 %v2879_v26, %v2852_v15  ;;  %4297 = vst [vmem:[#allocation36_spill] sm:$0xff] %v3270_v21 }
  0x50   : > { %2183 = vrot.lane.b32.xlu1 %v2182_v22, %s2726_s15  ;;  %v2728_v22 = vmov 65535  }
  0x51   : > { %2178 = vrot.lane.b32.xlu0 %v3196_v59, %s2723_s12  ;;  %v1251_v7 = vsel %vm1250_vm2, 4294967295, %v2728_v22  ;;  %v256_v59 = vld [vmem:[%s2819_s10 + $0xf0] sm:$0xff]  ;;  %v910_v22 = vrot.slane %v3267_v62, 2  ;;  %vm1839_vm2 = vcmask 1044484  }
  0x52   : > { %v1252_v57 = vsel %vm404_vm1, %v1251_v7, 0  ;;  %v836_v27 = vrot.slane %v256_v59, 1  ;;  %v912_v7 = vrot.slane %v3270_v21, 2  ;;  %v914_v46 = vrot.slane %v256_v59, 2 }
  0x53   : > { %v1254_v43 = vand.u32 %v1252_v57, %v1205_v36  ;;  %v1200_v57 = vld [vmem:[%s4215_s1] sm:$0xff]  ;;  %v1201_v36 = vld [vmem:[%s4215_s1 + $0x8] sm:$0xff] }
  0x54   : > { %2193 = vrot.lane.b32.xlu1 %v3228_v55, %s2723_s12 }
  0x55   : > { %2188 = vrot.lane.b32.xlu0 %v2187_v11, %s2727_s24  ;;  %v834_v11 = vrot.slane %v3270_v21, 1  ;;  %1985 = vmatprep.subr.bf16.mxu0 %v1254_v43  ;;  %v1204_v21 = vpack.c.bf16 %v1201_v36, %v1200_v57  ;;  %v446_v57 = vrot.slane %v2977_v10, 2 }
  0x56   : > { %1986 = vmatpush3.bf16.msra.mxu0 %v1254_v43  ;;  %2013 = vmatprep.subr.bf16.mxu1 %v1254_v43 }
  0x57   : > { %v3291_v35 = vsel %vm282_vm0, %v834_v11, %v836_v27  ;;  %2015 = vmatpush3.bf16.msra.mxu1 %v1254_v43  ;;  %1987 = vmatprep.subr.bf16.mxu0 %v1204_v21  ;;  %v3312_v43 = vsel %vm404_vm1, %v683_v60, %v910_v22  ;;  %v4299_v60 = vrot.slane %v2879_v26, 2 }
  0x58   : > { %2203 = vrot.lane.b32.xlu1 %v2202_v4, %s2727_s24  ;;  %v3288_v4 = vsel %vm282_vm0, %v832_v32, %v834_v11  ;;  %v3309_v11 = vsel %vm404_vm1, %v912_v7, %v914_v46  ;;  %2014 = vmatprep.subr.bf16.mxu1 %v1204_v21  ;;  %v442_v46 = vrot.slane %v2926_v50, 2 }
  0x59   : > { %2198 = vrot.lane.b32.xlu0 %v2197_v2, %s2724_s13  ;;  %v3294_v2 = vsel %vm282_vm0, %v605_v13, %v832_v32  ;;  %v2217_v32 = vpack.i.bf16 %v3001_v29, %v2951_v58  ;;  %v3306_v13 = vsel %vm404_vm1, %v910_v22, %v912_v7  ;;  %v2232_v58 = vpack.i.bf16 %v2990_v17, %v3004_v33  ;;  %v4301_v22 = vld [vmem:[#allocation21_spill] sm:$0xff] }
  0x5a   : > { %1988 = vmatpush3.bf16.msra.mxu0 %v1204_v21  ;;  %v4298_v29 = vrot.slane %v2860_v19, 2  ;;  %v2252_v33 = vpack.i.bf16 %v2926_v50, %v2911_v42  ;;  %v2262_v7 = vpack.i.bf16 %v2977_v10, %v2929_v51  ;;  %vm1835_vm0 = vcmask 1042434  }
  0x5b   : > { %2016 = vmatpush3.bf16.msra.mxu1 %v1204_v21 }
  0x5c   : > { %2213 = vrot.lane.b32.xlu1 %v2212_v23, %s2724_s13  ;;  %v425_v59 = vsel %vm404_vm1, %v4299_v60, %v4298_v29  ;;  %v4304_v29 = vpack.i.bf16 %v2919_v47, %v2939_v54  ;;  %v2317_v47 = vpack.i.bf16 %v2873_v24, %v2860_v19  ;;  %v2332_v54 = vpack.i.bf16 %v2900_v37, %v2876_v25  ;;  %v4343_v23 = vld [vmem:[#allocation6_spill] sm:$0xff] }
  0x5d   : > { %2208 = vrot.lane.b32.xlu0 %v2905_v38, %s2729_s8  ;;  %v2242_v21 = vpack.i.bf16 %v425_v59, %v3093_v49  ;;  %v4342_v38 = vld [vmem:[#allocation7_spill] sm:$0xff] }
  0x60   : > { %2223 = vrot.lane.b32.xlu1 %v2962_v61, %s2729_s8  ;;  %v4300_v61 = vrot.slane %v2911_v42, 2  ;;  %v2272_v42 = vpack.i.bf16 %v2860_v19, %v2879_v26  ;;  %v4305_v19 = vld [vmem:[#allocation13_spill] sm:$0xff] }
  0x61   : > { %2218 = vrot.lane.b32.xlu0 %v2217_v32, %s2725_s14  ;;  %v4303_v32 = vrot.slane %v2967_v0, 2 }
  0x62   : > { %v443_v17 = vsel %vm404_vm1, %v4300_v61, %v442_v46 }
  0x63   : > { %v2247_v27 = vpack.i.bf16 %v443_v17, %v3241_v6 }
  0x64   : > { %2233 = vrot.lane.b32.xlu1 %v2232_v58, %s2725_s14  ;;  %v449_v58 = vsel %vm404_vm1, %v446_v57, %v4303_v32 }
  0x65   : > { %2228 = vrot.lane.b32.xlu0 %v3083_v9, %s2730_s9  ;;  %v2257_v9 = vpack.i.bf16 %v2852_v15, %v2828_v3  ;;  %v4302_v3 = vpack.i.bf16 %v2936_v53, %v2895_v34  ;;  %v2312_v34 = vpack.i.bf16 %v3130_v1, %v425_v59  ;;  %v4306_v1 = vld [vmem:[#allocation20_spill] sm:$0xff] }
  0x68   : > { %2243 = vrot.lane.b32.xlu1 %v2242_v21, %s2730_s9 }
  0x69   : > { %2238 = vrot.lane.b32.xlu0 %v3228_v55, %s2726_s15  ;;  %v444_v55 = vrot.slane %v2929_v51, 2 }
  0x6b   : > { %v445_v36 = vsel %vm404_vm1, %v442_v46, %v444_v55  ;;  %v447_v26 = vsel %vm404_vm1, %v444_v55, %v446_v57  ;;  %v4309_v46 = vld [vmem:[#allocation25_spill] sm:$0xff]  ;;  %v4314_v55 = vld [vmem:[#allocation10_spill] sm:$0xff]  ;;  %vm1837_vm1 = vcmask 1043459  }
  0x6c   : > { %2253 = vrot.lane.b32.xlu1 %v2252_v33, %s2727_s24  ;;  %v2287_v15 = vpack.i.bf16 %v445_v36, %v443_v17  ;;  %v2302_v60 = vpack.i.bf16 %v449_v58, %v447_v26  ;;  %v2322_v53 = vpack.i.bf16 %v425_v59, %v445_v36  ;;  %v4307_v59 = vpack.i.bf16 %v3029_v44, %v2998_v28  ;;  %v4311_v44 = vld [vmem:[#allocation18_spill] sm:$0xff] }
  0x6d   : > { %2248 = vrot.lane.b32.xlu0 %v2247_v27, %s2726_s15  ;;  %v2367_v21 = vpack.i.bf16 %v447_v26, %v445_v36  ;;  %v4310_v28 = vpack.i.bf16 %v3114_v40, %v3096_v14  ;;  %v2382_v33 = vpack.i.bf16 %v4311_v44, %v2967_v0 }
  0x70   : > { %2263 = vrot.lane.b32.xlu1 %v2262_v7, %s2727_s24  ;;  %v2392_v7 = vpack.i.bf16 %v2876_v25, %v2873_v24  ;;  %v4313_v24 = vpack.i.bf16 %v3122_v8, %v2973_v5 }
  0x71   : > { %2258 = vrot.lane.b32.xlu0 %v2257_v9, %s2724_s13 }
  0x74   : > { %2273 = vrot.lane.b32.xlu1 %v2272_v42, %s2724_s13  ;;  %v4312_v42 = vld [vmem:[#allocation24_spill] sm:$0xff] }
  0x75   : > { %2268 = vrot.lane.b32.xlu0 %v4301_v22, %s2729_s8  ;;  %v2407_v22 = vpack.i.bf16 %v4314_v55, %v2900_v37 }
  0x78   : > { %2283 = vrot.lane.b32.xlu1 %v3046_v63, %s2729_s8  ;;  %v2297_v63 = vpack.i.bf16 %v3093_v49, %v3069_v52  ;;  %v2327_v52 = vpack.i.bf16 %v2929_v51, %v2926_v50  ;;  %v2342_v49 = vpack.i.bf16 %v2967_v0, %v2977_v10  ;;  %v4308_v10 = vpack.i.bf16 %v3019_v41, %v3032_v45 }
  0x79   : > { %2278 = vrot.lane.b32.xlu0 %v4302_v3, %s2725_s14  ;;  %v2377_v41 = vpack.i.bf16 %v3171_v48, %v449_v58  ;;  %v4317_v3 = vld [vmem:[#allocation16_spill] sm:$0xff] }
  0x7c   : > { %2293 = vrot.lane.b32.xlu1 %v4304_v29, %s2725_s14  ;;  %v4320_v29 = vpack.i.bf16 %v3186_v18, %v3179_v39 }
  0x7d   : > { %2288 = vrot.lane.b32.xlu0 %v2287_v15, %s2730_s9  ;;  %v4318_v15 = vld [vmem:[#allocation12_spill] sm:$0xff] }
  0x7e   : > { %v4319_v26 = vpack.i.bf16 %v4317_v3, %v4318_v15  ;;  %v4332_v3 = vld [vmem:[#allocation26_spill] sm:$0xff] }
  0x7f   : > { %v2477_v15 = vpack.i.bf16 %v4332_v3, %v3122_v8 }
  0x80   : > { %2303 = vrot.lane.b32.xlu1 %v2302_v60, %s2730_s9 }
  0x81   : > { %2298 = vrot.lane.b32.xlu0 %v2297_v63, %s2726_s15 }
  0x84   : > { %2313 = vrot.lane.b32.xlu1 %v2312_v34, %s2726_s15 }
  0x85   : > { %2308 = vrot.lane.b32.xlu0 %v2247_v27, %s2723_s12 }
  0x88   : > { %2323 = vrot.lane.b32.xlu1 %v2322_v53, %s2723_s12  ;;  %v4321_v53 = vpack.i.bf16 %v3096_v14, %v3133_v20 }
  0x89   : > { %2318 = vrot.lane.b32.xlu0 %v2317_v47, %s2727_s24  ;;  %v4322_v47 = vld [vmem:[#allocation15_spill] sm:$0xff] }
  0x8c   : > { %2333 = vrot.lane.b32.xlu1 %v2332_v54, %s2727_s24  ;;  %v4323_v54 = vld [vmem:[#allocation17_spill] sm:$0xff] }
  0x8d   : > { %2328 = vrot.lane.b32.xlu0 %v2327_v52, %s2724_s13  ;;  %v4324_v52 = vpack.i.bf16 %v4322_v47, %v4323_v54  ;;  %v4333_v47 = vld [vmem:[#allocation23_spill] sm:$0xff] }
  0x8e   : > { %v4334_v54 = vpack.i.bf16 %v3179_v39, %v4333_v47  ;;  %v4335_v39 = vld [vmem:[#allocation30_spill] sm:$0xff] }
  0x90   : > { %2343 = vrot.lane.b32.xlu1 %v2342_v49, %s2724_s13 }
  0x91   : > { %2338 = vrot.lane.b32.xlu0 %v4305_v19, %s2729_s8 }
  0x94   : > { %2353 = vrot.lane.b32.xlu1 %v4306_v1, %s2729_s8  ;;  %v2452_v1 = vpack.i.bf16 %v2889_v31, %v4314_v55 }
  0x95   : > { %2348 = vrot.lane.b32.xlu0 %v4307_v59, %s2725_s14  ;;  %v4325_v59 = vld [vmem:[#allocation33_spill] sm:$0xff] }
  0x96   : > { %v3401_v50 = vpop.permute.xlu1 %2078 }
  0x97   : > { %v3403_v51 = vpop.permute.xlu0 %2068 }
  0x98   : > { %2363 = vrot.lane.b32.xlu1 %v4308_v10, %s2725_s14  ;;  %v4326_v10 = vld [vmem:[#allocation32_spill] sm:$0xff] }
  0x99   : > { %2358 = vrot.lane.b32.xlu0 %v4309_v46, %s2730_s9 }
  0x9a   : > { %v3411_v61 = vpop.permute.xlu1 %2083 }
  0x9b   : > { %v3413_v17 = vpop.permute.xlu0 %2073 }
  0x9c   : > { %2373 = vrot.lane.b32.xlu1 %v4310_v28, %s2730_s9  ;;  %v4328_v28 = vld [vmem:[#allocation29_spill] sm:$0xff] }
  0x9d   : > { %2368 = vrot.lane.b32.xlu0 %v2367_v21, %s2726_s15  ;;  %v2462_v21 = vpack.i.bf16 %v2973_v5, %v4311_v44  ;;  %v4331_v44 = vld [vmem:[#allocation19_spill] sm:$0xff] }
  0x9e   : > { %v3423_v45 = vpop.permute.xlu1 %2093 }
  0x9f   : > { %v3425_v27 = vpop.permute.xlu0 %2088 }
  0xa0   : > { %2383 = vrot.lane.b32.xlu1 %v2382_v33, %s2727_s24 }
  0xa1   : > { %2378 = vrot.lane.b32.xlu0 %v2377_v41, %s2726_s15  ;;  %v4329_v41 = vld [vmem:[#allocation11_spill] sm:$0xff] }
  0xa2   : > { %v3431_v40 = vpop.permute.xlu1 %2103 }
  0xa3   : > { %v3433_v9 = vpop.permute.xlu0 %2098 }
  0xa4   : > { %2393 = vrot.lane.b32.xlu1 %v2392_v7, %s2724_s13  ;;  %v4330_v7 = vmov %v2943_v56 }
  0xa5   : > { %2388 = vrot.lane.b32.xlu0 %v4309_v46, %s2723_s12  ;;  %v4327_v46 = vpack.i.bf16 %v4325_v59, %v4326_v10 }
  0xa6   : > { %v3438_v48 = vpop.permute.xlu1 %2113 }
  0xa7   : > { %v3440_v0 = vpop.permute.xlu0 %2108 }
  0xa8   : > { %2403 = vrot.lane.b32.xlu1 %v4312_v42, %s2729_s8  ;;  %v2467_v42 = vpack.i.bf16 %v4330_v7, %v4329_v41  ;;  %v2110_v5 = vunpack.i.l.bf16 %v3440_v0 }
  0xa9   : > { %2398 = vrot.lane.b32.xlu0 %v4313_v24, %s2727_s24 }
  0xaa   : > { %v3450_v57 = vpop.permute.xlu1 %2123 }
  0xab   : > { %4315 = vst [vmem:[#allocation21_spill] sm:$0xff] %v3450_v57  ;;  %v3452_v36 = vpop.permute.xlu0 %2118 }
  0xac   : > { %4316 = vst [vmem:[#allocation13_spill] sm:$0xff] %v3452_v36  ;;  %2413 = vrot.lane.b32.xlu1 %v4319_v26, %s2725_s14 }
  0xad   : > { %2408 = vrot.lane.b32.xlu0 %v2407_v22, %s2724_s13 }
  0xae   : > { %v3459_v32 = vpop.permute.xlu1 %2133 }
  0xaf   : > { %v3461_v58 = vpop.permute.xlu0 %2128 }
  0xb0   : > { %2423 = vrot.lane.b32.xlu1 %v3183_v30, %s2730_s9 }
  0xb1   : > { %2418 = vrot.lane.b32.xlu0 %v4320_v29, %s2729_s8 }
  0xb2   : > { %v3469_v63 = vpop.permute.xlu1 %2143 }
  0xb3   : > { %v3471_v34 = vpop.permute.xlu0 %2138 }
  0xb4   : > { %2433 = vrot.lane.b32.xlu1 %v4321_v53, %s2726_s15  ;;  %v1005_v53 = vsel %vm988_vm3, %v4329_v41, %v2110_v5  ;;  %v4336_v41 = vld [vmem:[#allocation27_spill] sm:$0xff]  ;;  %v2136_v5 = vunpack.i.h.bf16 %v3459_v32 }
  0xb5   : > { %2428 = vrot.lane.b32.xlu0 %v4324_v52, %s2725_s14  ;;  %v4337_v7 = vpack.i.bf16 %v4335_v39, %v4336_v41  ;;  %v4340_v39 = vld [vmem:[#allocation36_spill] sm:$0xff] }
  0xb6   : > { %v3481_v49 = vpop.permute.xlu1 %2153 }
  0xb7   : > { %v3483_v19 = vpop.permute.xlu0 %2148 }
  0xb8   : > { %2443 = vrot.lane.b32.xlu1 %v2302_v60, %s2723_s12 }
  0xb9   : > { %2438 = vrot.lane.b32.xlu0 %v4327_v46, %s2730_s9  ;;  %v2076_v46 = vunpack.i.h.bf16 %v3413_v17 }
  0xba   : > { %v3492_v14 = vpop.permute.xlu1 %2163 }
  0xbb   : > { %v3494_v20 = vpop.permute.xlu0 %2158  ;;  %v992_v56 = vsel %vm988_vm3, %v4343_v23, %v2076_v46  ;;  %v2166_v57 = vunpack.i.h.bf16 %v3492_v14  ;;  %v4347_v23 = vld [vmem:[#allocation8_spill] sm:$0xff] }
  0xbc   : > { %2453 = vrot.lane.b32.xlu1 %v2452_v1, %s2727_s24  ;;  %v2070_v1 = vunpack.i.l.bf16 %v3403_v51 }
  0xbd   : > { %2448 = vrot.lane.b32.xlu0 %v4328_v28, %s2726_s15 }
  0xbe   : > { %v3501_v60 = vpop.permute.xlu1 %2173 }
  0xbf   : > { %v3503_v33 = vpop.permute.xlu0 %2168 }
  0xc0   : > { %2463 = vrot.lane.b32.xlu1 %v2462_v21, %s2724_s13  ;;  %v2075_v21 = vunpack.i.l.bf16 %v3413_v17  ;;  %v4338_v17 = vld [vmem:[#allocation22_spill] sm:$0xff] }
  0xc1   : > { %2458 = vrot.lane.b32.xlu0 %v3183_v30, %s2723_s12 }
  0xc2   : > { %v3510_v24 = vpop.permute.xlu1 %2183 }
  0xc3   : > { %v3512_v22 = vpop.permute.xlu0 %2178 }
  0xc4   : > { %2473 = vrot.lane.b32.xlu1 %v4331_v44, %s2729_s8  ;;  %v2135_v44 = vunpack.i.l.bf16 %v3459_v32  ;;  %v989_v32 = vsel %vm988_vm3, %v4342_v38, %v2070_v1  ;;  %v4345_v38 = vld [vmem:[#allocation28_spill] sm:$0xff] }
  0xc5   : > { %2468 = vrot.lane.b32.xlu0 %v2467_v42, %s2727_s24  ;;  %v2071_v42 = vunpack.i.h.bf16 %v3403_v51  ;;  %v4341_v51 = vld [vmem:[#allocation34_spill] sm:$0xff]  ;;  %v4346_v1 = vpack.i.bf16 %v4326_v10, %v4345_v38  ;;  %v2176_v10 = vunpack.i.h.bf16 %v3501_v60  ;;  %v2175_v38 = vunpack.i.l.bf16 %v3501_v60 }
  0xc6   : > { %v3520_v26 = vpop.permute.xlu1 %2193 }
  0xc7   : > { %v2196_v30 = vunpack.i.h.bf16 %v3520_v26  ;;  %v3523_v29 = vpop.permute.xlu0 %2188  ;;  %v990_v46 = vsel %vm988_vm3, %v4347_v23, %v2071_v42 }
  0xc8   : > { %2483 = vrot.lane.b32.xlu1 %v4334_v54, %s2725_s14  ;;  %v4339_v54 = vmov %v3267_v62  ;;  %v2156_v62 = vunpack.i.h.bf16 %v3481_v49 }
  0xc9   : > { %v3532_v52 = vsel %vm1013_vm4, %v1005_v53, %v2196_v30  ;;  %2478 = vrot.lane.b32.xlu0 %v2477_v15, %s2724_s13  ;;  %v2130_v15 = vunpack.i.l.bf16 %v3461_v58  ;;  %v2131_v30 = vunpack.i.h.bf16 %v3461_v58  ;;  %v2155_v53 = vunpack.i.l.bf16 %v3481_v49 }
  0xca   : > { %v3535_v8 = vpop.permute.xlu1 %2203  ;;  %v2522_v41 = vpack.i.bf16 %v4340_v39, %v4339_v54  ;;  %v2165_v54 = vunpack.i.l.bf16 %v3492_v14  ;;  %v2161_v39 = vunpack.i.h.bf16 %v3494_v20  ;;  %v4348_v14 = vpack.i.bf16 %v3236_v12, %v3186_v18 }
  0xcb   : > { %v3540_v28 = vpop.permute.xlu0 %2198 }
  0xcc   : > { %2493 = vrot.lane.b32.xlu1 %v4337_v7, %s2730_s9  ;;  %v2517_v7 = vpack.i.bf16 %v4341_v51, %v4332_v3  ;;  %v2160_v3 = vunpack.i.l.bf16 %v3494_v20  ;;  %v1014_v51 = vsel %vm1013_vm4, %v989_v32, %v2130_v15  ;;  %v1015_v20 = vsel %vm1013_vm4, %v990_v46, %v2131_v30 }
  0xcd   : > { %2488 = vrot.lane.b32.xlu0 %v4338_v17, %s2729_s8  ;;  %v4344_v17 = vld [vmem:[#allocation9_spill] sm:$0xff]  ;;  %v2190_v15 = vunpack.i.l.bf16 %v3523_v29 }
  0xce   : > { %v3554_v47 = vpop.permute.xlu1 %2213  ;;  %v991_v58 = vsel %vm988_vm3, %v4344_v17, %v2075_v21  ;;  %v1017_v21 = vsel %vm1013_vm4, %v992_v56, %v2136_v5  ;;  %v1039_v17 = vsel %vm1038_vm5, %v1014_v51, %v2155_v53  ;;  %v2170_v56 = vunpack.i.l.bf16 %v3503_v33 }
  0xcf   : > { %v2209_v36 = vpop.permute.xlu0 %2208  ;;  %v1016_v49 = vsel %vm1013_vm4, %v991_v58, %v2135_v44  ;;  %v1040_v44 = vsel %vm1038_vm5, %v1015_v20, %v2156_v62  ;;  %v2191_v5 = vunpack.i.h.bf16 %v3523_v29  ;;  %v1064_v30 = vsel %vm1063_vm6, %v1039_v17, %v2165_v54  ;;  %v4350_v54 = vld [vmem:[#allocation31_spill] sm:$0xff] }
  0xd0   : > { %2503 = vrot.lane.b32.xlu1 %v4346_v1, %s2726_s15  ;;  %v1065_v53 = vsel %vm1063_vm6, %v1040_v44, %v2166_v57  ;;  %v1041_v32 = vsel %vm1038_vm5, %v1016_v49, %v2160_v3  ;;  %v1042_v60 = vsel %vm1038_vm5, %v1017_v21, %v2161_v39  ;;  %v4349_v62 = vpack.i.bf16 %v3246_v16, %v4325_v59 }
  0xd1   : > { %2498 = vrot.lane.b32.xlu0 %v4348_v14, %s2725_s14  ;;  %v2171_v58 = vunpack.i.h.bf16 %v3503_v33  ;;  %v2185_v1 = vunpack.i.l.bf16 %v3510_v24  ;;  %v2211_v29 = vunpack.i.h.bf16 %v2209_v36  ;;  %v2210_v23 = vunpack.i.l.bf16 %v2209_v36  ;;  %s217_s14 = sand.u32 1, %s2712_s21  }
  0xd2   : > { %v2224_v42 = vpop.permute.xlu1 %2223  ;;  %v4351_v46 = vpack.i.bf16 %v3241_v6, %v4350_v54  ;;  %v1089_v57 = vsel %vm1088_vm7, %v1064_v30, %v2175_v38  ;;  %v1090_v39 = vsel %vm1088_vm7, %v1065_v53, %v2176_v10  ;;  %v2186_v3 = vunpack.i.h.bf16 %v3510_v24  ;;  %s1850_s4 = scalar_lea.sflag [#allocation4], %s217_s14 }
  0xd3   : > { %v3592_v18 = vpop.permute.xlu0 %2218  ;;  %v2205_v59 = vunpack.i.l.bf16 %v3535_v8  ;;  %v1066_v33 = vsel %vm1063_vm6, %v1041_v32, %v2170_v56  ;;  %v1114_v21 = vsel %vm1113_vm8, %v1089_v57, %v2190_v15  ;;  %v1115_v36 = vsel %vm1113_vm8, %v1090_v39, %v2191_v5 }
  0xd4   : > { %2513 = vrot.lane.b32.xlu1 %v4349_v62, %s2726_s15  ;;  %v2206_v51 = vunpack.i.h.bf16 %v3535_v8  ;;  %v2226_v14 = vunpack.i.h.bf16 %v2224_v42  ;;  %v2225_v20 = vunpack.i.l.bf16 %v2224_v42  ;;  %v1067_v24 = vsel %vm1063_vm6, %v1042_v60, %v2171_v58  ;;  %s4154_s15 = sshll.u32 %s217_s14, 3 }
  0xd5   : > { %2508 = vrot.lane.b32.xlu0 %v4351_v46, %s2730_s9  ;;  %v1091_v10 = vsel %vm1088_vm7, %v1066_v33, %v2185_v1  ;;  %v1139_v44 = vsel %vm1138_vm9, %v1114_v21, %v2210_v23  ;;  %v1140_v56 = vsel %vm1138_vm9, %v1115_v36, %v2211_v29  ;;  %v1092_v5 = vsel %vm1088_vm7, %v1067_v24, %v2186_v3  ;;  %s219_s17 = scalar_lea.vmem [#allocation3], %s4154_s15 }
  0xd6   : > { %v3612_v49 = vpop.permute.xlu1 %2233  ;;  %v1116_v8 = vsel %vm1113_vm8, %v1091_v10, %v2205_v59  ;;  %v4352_v1 = vpack.i.bf16 %v3291_v35, %v3288_v4  ;;  %v4353_v54 = vpack.i.bf16 %v3294_v2, %v3236_v12  ;;  %v4354_v4 = vpack.i.bf16 %v3309_v11, %v3306_v13  ;;  %s1863_s18 = sshll.u32 %s219_s17, 4  ;;  %s1864_s18 = int_to_ptr.vmem [resolvable:$true] %s1863_s18 }
  0xd7   : > { %v2229_v6 = vpop.permute.xlu0 %2228  ;;  %v4355_v35 = vpack.i.bf16 %v3312_v43, %v3246_v16  ;;  %v2105_v2 = vunpack.i.l.bf16 %v3431_v40  ;;  %v2101_v3 = vunpack.i.h.bf16 %v3433_v9  ;;  %v2100_v59 = vunpack.i.l.bf16 %v3433_v9  ;;  %s2660_s27 = scalar_lea.vmem %s1864_s18, 128  ;;  %p2667_p0 = scmp.lt.s32.totalorder %s1864_s18, %s2665_s7 }
  0xd8   : > { %v2231_v17 = vunpack.i.h.bf16 %v2229_v6  ;;  %v2230_v38 = vunpack.i.l.bf16 %v2229_v6  ;;  %2523 = vrot.lane.b32.xlu1 %v2522_v41, %s2727_s24  ;;  %v1117_v41 = vsel %vm1113_vm8, %v1092_v5, %v2206_v51  ;;  %v2106_v13 = vunpack.i.h.bf16 %v3431_v40  ;;  %p2661_p11 = scmp.ne.s32.totalorder %s1864_s18, %s2660_s27 }
  0xd9   : > { %2518 = vrot.lane.b32.xlu0 %v2517_v7, %s2727_s24  ;;  %v1141_v7 = vsel %vm1138_vm9, %v1116_v8, %v2225_v20  ;;  %v1142_v58 = vsel %vm1138_vm9, %v1117_v41, %v2226_v14  ;;  %v2151_v11 = vunpack.i.h.bf16 %v3483_v19  ;;  %v2181_v21 = vunpack.i.h.bf16 %v3512_v22 }
  0xda   : > { %v2244_v15 = vpop.permute.xlu1 %2243  ;;  %v1164_v42 = vsel %vm1163_vm10, %v1139_v44, %v2230_v38  ;;  %v1165_v30 = vsel %vm1163_vm10, %v1140_v56, %v2231_v17  ;;  %v2180_v36 = vunpack.i.l.bf16 %v3512_v22  ;;  %v2195_v16 = vunpack.i.l.bf16 %v3520_v26  ;;  %p2662_p12 = pnand %p2661_p11, %p2804_p5 }
  0xdb   : > { %v2246_v53 = vunpack.i.h.bf16 %v2244_v15  ;;  %v2245_v32 = vunpack.i.l.bf16 %v2244_v15  ;;  %v2239_v60 = vpop.permute.xlu0 %2238  ;;  %v1188_v62 = vpack.c.bf16 %v1165_v30, %v1164_v42  ;;  %v2200_v43 = vunpack.i.l.bf16 %v3540_v28 }
  0xdc   : > { %2533 = vrot.lane.b32.xlu1 %v4352_v1, %s2729_s8  ;;  %v1003_v6 = vsel %vm988_vm3, %v4314_v55, %v2105_v2  ;;  %v1002_v9 = vsel %vm988_vm3, %v2900_v37, %v2101_v3  ;;  %v1001_v40 = vsel %vm988_vm3, %v2876_v25, %v2100_v59  ;;  %v2201_v14 = vunpack.i.h.bf16 %v3540_v28  ;;  %p2663_p13 = pneg %p2662_p12 }
  0xdd   : > { %v1166_v29 = vsel %vm1163_vm10, %v1141_v7, %v2245_v32  ;;  %v1167_v23 = vsel %vm1163_vm10, %v1142_v58, %v2246_v53  ;;  %2528 = vrot.lane.b32.xlu0 %v4353_v54, %s2729_s8  ;;  %1989 = vmatprep.mubr.msk.bf16.mxu0 %vm1213_vm11, %v1188_v62  ;;  %v2216_v22 = vunpack.i.h.bf16 %v3554_v47  ;;  %v2215_v26 = vunpack.i.l.bf16 %v3554_v47  ;;  %s2666_s8 = scalar_lea.vmem %s2665_s7, 256 }
  0xde   : > { %v1189_v46 = vpack.c.bf16 %v1167_v23, %v1166_v29  ;;  %v2254_v57 = vpop.permute.xlu1 %2253  ;;  %v2221_v17 = vunpack.i.h.bf16 %v3592_v18  ;;  %v2220_v38 = vunpack.i.l.bf16 %v3592_v18  ;;  %v1004_v55 = vsel %vm988_vm3, %v2889_v31, %v2106_v13  ;;  %p2668_p1 = scmp.lt.s32.totalorder %s2666_s8, %s2660_s27 }
  0xdf   : > { %v3642_v39 = vpop.permute.xlu0 %2248  ;;  %v1026_v24 = vsel %vm1013_vm4, %v1001_v40, %v2151_v11  ;;  %v1028_v37 = vsel %vm1013_vm4, %v1003_v6, %v2181_v21  ;;  %v1027_v25 = vsel %vm1013_vm4, %v1002_v9, %v2180_v36  ;;  %v1029_v28 = vsel %vm1013_vm4, %v1004_v55, %v2195_v16 }
  0xe0   : > { %2543 = vrot.lane.b32.xlu1 %v4354_v4, %s2730_s9  ;;  %1990 = vmatmul.mubr.msk.bf16.vlgmr.msra.gmra.mxu0 %vm1213_vm11, %v1189_v46  ;;  %v1051_v10 = vsel %vm1038_vm5, %v1026_v24, %v2200_v43  ;;  %v2241_v44 = vunpack.i.h.bf16 %v2239_v60  ;;  %v2240_v56 = vunpack.i.l.bf16 %v2239_v60  ;;  %v1052_v5 = vsel %vm1038_vm5, %v1027_v25, %v2201_v14  ;;  %p2669_p2 = por %p2668_p1, %p2667_p0 }
  0xe1   : > { %2538 = vrot.lane.b32.xlu0 %v4355_v35, %s2730_s9  ;;  %v2235_v18 = vunpack.i.l.bf16 %v3612_v49  ;;  %v2256_v8 = vunpack.i.h.bf16 %v2254_v57  ;;  %v2255_v15 = vunpack.i.l.bf16 %v2254_v57  ;;  %v1053_v42 = vsel %vm1038_vm5, %v1028_v37, %v2215_v26 }
  0xe2   : > { %v3653_v12 = vpop.permute.xlu1 %2263  ;;  %v1054_v30 = vsel %vm1038_vm5, %v1029_v28, %v2216_v22  ;;  %v1076_v41 = vsel %vm1063_vm6, %v1051_v10, %v2220_v38  ;;  %v1077_v53 = vsel %vm1063_vm6, %v1052_v5, %v2221_v17  ;;  %v2236_v32 = vunpack.i.h.bf16 %v3612_v49  ;;  %p2670_p3 = pnand %p2669_p2, %p2663_p13 }
  0xe3   : > { %v3658_v33 = vpop.permute.xlu0 %2258  ;;  %v2250_v60 = vunpack.i.l.bf16 %v3642_v39  ;;  %v1101_v58 = vsel %vm1088_vm7, %v1076_v41, %v2240_v56  ;;  %v1102_v1 = vsel %vm1088_vm7, %v1077_v53, %v2241_v44  ;;  %v2251_v29 = vunpack.i.h.bf16 %v3642_v39 }
  0xe4   : > { %v2265_v23 = vunpack.i.l.bf16 %v3653_v12  ;;  %v1078_v46 = vsel %vm1063_vm6, %v1053_v42, %v2235_v18  ;;  %v1126_v57 = vsel %vm1113_vm8, %v1101_v58, %v2255_v15  ;;  %v1127_v49 = vsel %vm1113_vm8, %v1102_v1, %v2256_v8 }
  0xe5   : > { %v2266_v4 = vunpack.i.h.bf16 %v3653_v12  ;;  %v1079_v11 = vsel %vm1063_vm6, %v1054_v30, %v2236_v32  ;;  %v1103_v39 = vsel %vm1088_vm7, %v1078_v46, %v2250_v60  ;;  %v2086_v5 = vunpack.i.h.bf16 %v3411_v61 }
  0xe6   : > { %v3666_v51 = vpop.permute.xlu1 %2273  ;;  %v1104_v16 = vsel %vm1088_vm7, %v1079_v11, %v2251_v29  ;;  %v1128_v43 = vsel %vm1113_vm8, %v1103_v39, %v2265_v23  ;;  %v2085_v18 = vunpack.i.l.bf16 %v3411_v61  ;;  %v2081_v15 = vunpack.i.h.bf16 %v3401_v50 }
  0xe7   : > { %v2269_v20 = vpop.permute.xlu0 %2268  ;;  %v1129_v40 = vsel %vm1113_vm8, %v1104_v16, %v2266_v4  ;;  %v2146_v42 = vunpack.i.h.bf16 %v3469_v63  ;;  %v2145_v30 = vunpack.i.l.bf16 %v3469_v63  ;;  %v2140_v41 = vunpack.i.l.bf16 %v3471_v34 }
  0xe8   : > { %v2271_v62 = vunpack.i.h.bf16 %v2269_v20  ;;  %v2270_v7 = vunpack.i.l.bf16 %v2269_v20  ;;  %v2141_v53 = vunpack.i.h.bf16 %v3471_v34  ;;  %v2260_v32 = vunpack.i.l.bf16 %v3658_v33 }
  0xe9   : > { %v2261_v63 = vunpack.i.h.bf16 %v3658_v33  ;;  %v2276_v23 = vunpack.i.h.bf16 %v3666_v51  ;;  %v2275_v34 = vunpack.i.l.bf16 %v3666_v51 }
  0xea   : > { %v2284_v47 = vpop.permute.xlu1 %2283  ;;  %v1151_v21 = vsel %vm1138_vm9, %v1126_v57, %v2270_v7  ;;  %v1152_v36 = vsel %vm1138_vm9, %v1127_v49, %v2271_v62  ;;  %v2645_v62 = vld [vmem:[%s2819_s10 + $0x20] sm:$0xff]  ;;  %v2646_v7 = vld [vmem:[%s2819_s10 + $0x38] sm:$0xff]  ;;  %v2648_v49 = vld [vmem:[%s2819_s10 + $0x28] sm:$0xff] }
  0xeb   : > { %v3688_v31 = vpop.permute.xlu0 %2278  ;;  %v2286_v2 = vunpack.i.h.bf16 %v2284_v47  ;;  %v2285_v3 = vunpack.i.l.bf16 %v2284_v47  ;;  %v2080_v47 = vunpack.i.l.bf16 %v3401_v50  ;;  %v996_v58 = vsel %vm988_vm3, %v2646_v7, %v2086_v5  ;;  %v2647_v50 = vld [vmem:[%s2819_s10 + $0x30] sm:$0xff] }
  0xec   : > { %v995_v1 = vsel %vm988_vm3, %v2647_v50, %v2085_v18  ;;  %v2281_v46 = vunpack.i.h.bf16 %v3688_v31  ;;  %v2280_v57 = vunpack.i.l.bf16 %v3688_v31  ;;  %v994_v4 = vsel %vm988_vm3, %v2648_v49, %v2081_v15 }
  0xed   : > { %v1153_v17 = vsel %vm1138_vm9, %v1128_v43, %v2285_v3  ;;  %v1154_v38 = vsel %vm1138_vm9, %v1129_v40, %v2286_v2  ;;  %v993_v61 = vsel %vm988_vm3, %v2645_v62, %v2080_v47  ;;  %v1020_v2 = vsel %vm1013_vm4, %v995_v1, %v2145_v30 }
  0xee   : > { %v3700_v54 = vpop.permute.xlu1 %2293  ;;  %v1018_v3 = vsel %vm1013_vm4, %v993_v61, %v2140_v41  ;;  %v1019_v33 = vsel %vm1013_vm4, %v994_v4, %v2141_v53  ;;  %v1045_v43 = vsel %vm1038_vm5, %v1020_v2, %v2275_v34 }
  0xef   : > { %v2289_v35 = vpop.permute.xlu0 %2288  ;;  %v1044_v31 = vsel %vm1038_vm5, %v1019_v33, %v2261_v63  ;;  %v2295_v39 = vunpack.i.l.bf16 %v3700_v54  ;;  %v2296_v40 = vunpack.i.h.bf16 %v3700_v54 }
  0xf0   : > { %v2291_v59 = vunpack.i.h.bf16 %v2289_v35  ;;  %v2290_v13 = vunpack.i.l.bf16 %v2289_v35  ;;  %v1021_v35 = vsel %vm1013_vm4, %v996_v58, %v2146_v42 }
  0xf2   : > { %v2304_v6 = vpop.permute.xlu1 %2303  ;;  %v1176_v12 = vsel %vm1163_vm10, %v1151_v21, %v2290_v13  ;;  %v1177_v9 = vsel %vm1163_vm10, %v1152_v36, %v2291_v59  ;;  %v1043_v59 = vsel %vm1038_vm5, %v1018_v3, %v2260_v32 }
  0xf3   : > { %v2306_v14 = vunpack.i.h.bf16 %v2304_v6  ;;  %v2305_v20 = vunpack.i.l.bf16 %v2304_v6  ;;  %v3715_v22 = vpop.permute.xlu0 %2298  ;;  %v1194_v26 = vpack.c.bf16 %v1177_v9, %v1176_v12  ;;  %v1046_v6 = vsel %vm1038_vm5, %v1021_v35, %v2276_v23 }
  0xf4   : > { %v2301_v13 = vunpack.i.h.bf16 %v3715_v22  ;;  %v2300_v51 = vunpack.i.l.bf16 %v3715_v22  ;;  %v1068_v12 = vsel %vm1063_vm6, %v1043_v59, %v2280_v57  ;;  %v1069_v9 = vsel %vm1063_vm6, %v1044_v31, %v2281_v46 }
  0xf5   : > { %v1178_v55 = vsel %vm1163_vm10, %v1153_v17, %v2305_v20  ;;  %v1179_v24 = vsel %vm1163_vm10, %v1154_v38, %v2306_v14  ;;  %2001 = vmatprep.mubr.msk.bf16.mxu1 %vm1213_vm11, %v1194_v26  ;;  %v1071_v41 = vsel %vm1063_vm6, %v1046_v6, %v2296_v40  ;;  %v2111_v59 = vunpack.i.h.bf16 %v3440_v0 }
  0xf6   : > { %v1195_v37 = vpack.c.bf16 %v1179_v24, %v1178_v55  ;;  %v3722_v25 = vpop.permute.xlu1 %2313  ;;  %v1093_v26 = vsel %vm1088_vm7, %v1068_v12, %v2300_v51  ;;  %v1094_v17 = vsel %vm1088_vm7, %v1069_v9, %v2301_v13 }
  0xf7   : > { %v3724_v28 = vpop.permute.xlu0 %2308  ;;  %v2315_v14 = vunpack.i.l.bf16 %v3722_v25  ;;  %v2316_v38 = vunpack.i.h.bf16 %v3722_v25 }
  0xf8   : > { %2002 = vmatmul.mubr.msk.bf16.vlgmr.msra.gmra.mxu1 %vm1213_vm11, %v1195_v37  ;;  %v1070_v37 = vsel %vm1063_vm6, %v1045_v43, %v2295_v39  ;;  %v2310_v51 = vunpack.i.l.bf16 %v3724_v28  ;;  %v2649_v43 = vld [vmem:[%s2819_s10 + $0x88] sm:$0xff] }
  0xf9   : > { %v1095_v25 = vsel %vm1088_vm7, %v1070_v37, %v2315_v14  ;;  %v1096_v62 = vsel %vm1088_vm7, %v1071_v41, %v2316_v38  ;;  %v1006_v6 = vsel %vm988_vm3, %v2649_v43, %v2111_v59  ;;  %v2116_v37 = vunpack.i.h.bf16 %v3438_v48 }
  0xfa   : > { %v3727_v10 = vpop.permute.xlu1 %2323  ;;  %v1031_v0 = vsel %vm1013_vm4, %v1006_v6, %v2310_v51  ;;  %v2311_v41 = vunpack.i.h.bf16 %v3724_v28 }
  0xfb   : > { %v2319_v44 = vpop.permute.xlu0 %2318 }
  0xfc   : > { %v2321_v21 = vunpack.i.h.bf16 %v2319_v44  ;;  %v2320_v36 = vunpack.i.l.bf16 %v2319_v44 }
  0xfe   : > { %v3729_v56 = vpop.permute.xlu1 %2333  ;;  %v1118_v44 = vsel %vm1113_vm8, %v1093_v26, %v2320_v36  ;;  %v1119_v54 = vsel %vm1113_vm8, %v1094_v17, %v2321_v21 }
  0xff   : > { %v3734_v8 = vpop.permute.xlu0 %2328  ;;  %v2335_v55 = vunpack.i.l.bf16 %v3729_v56  ;;  %v2336_v47 = vunpack.i.h.bf16 %v3729_v56 }
 0x100   : > { %v2331_v31 = vunpack.i.h.bf16 %v3734_v8  ;;  %v2330_v39 = vunpack.i.l.bf16 %v3734_v8 }
 0x101   : > { %v1120_v61 = vsel %vm1113_vm8, %v1095_v25, %v2335_v55  ;;  %v1121_v50 = vsel %vm1113_vm8, %v1096_v62, %v2336_v47  ;;  %v2325_v25 = vunpack.i.l.bf16 %v3727_v10 }
 0x102   : > { %v3742_v60 = vpop.permute.xlu1 %2343  ;;  %v1055_v8 = vsel %vm1038_vm5, %v3532_v52, %v2330_v39  ;;  %v1056_v26 = vsel %vm1038_vm5, %v1031_v0, %v2331_v31 }
 0x103   : > { %v2339_v29 = vpop.permute.xlu0 %2338  ;;  %v2345_v62 = vunpack.i.l.bf16 %v3742_v60 }
 0x104   : > { %v2341_v20 = vunpack.i.h.bf16 %v2339_v29  ;;  %v2340_v22 = vunpack.i.l.bf16 %v2339_v29 }
 0x106   : > { %v2354_v11 = vpop.permute.xlu1 %2353  ;;  %v1143_v53 = vsel %vm1138_vm9, %v1118_v44, %v2340_v22  ;;  %v1144_v32 = vsel %vm1138_vm9, %v1119_v54, %v2341_v20  ;;  %v2115_v44 = vunpack.i.l.bf16 %v3438_v48 }
 0x107   : > { %v3766_v16 = vpop.permute.xlu0 %2348  ;;  %v2356_v18 = vunpack.i.h.bf16 %v2354_v11  ;;  %v2355_v15 = vunpack.i.l.bf16 %v2354_v11 }
 0x108   : > { %v2351_v21 = vunpack.i.h.bf16 %v3766_v16  ;;  %v2350_v36 = vunpack.i.l.bf16 %v3766_v16 }
 0x109   : > { %v1145_v34 = vsel %vm1138_vm9, %v1120_v61, %v2355_v15  ;;  %v1146_v46 = vsel %vm1138_vm9, %v1121_v50, %v2356_v18 }
 0x10a   : > { %v3778_v24 = vpop.permute.xlu1 %2363  ;;  %v1080_v38 = vsel %vm1063_vm6, %v1055_v8, %v2350_v36  ;;  %v1081_v55 = vsel %vm1063_vm6, %v1056_v26, %v2351_v21 }
 0x10b   : > { %v2359_v5 = vpop.permute.xlu0 %2358 }
 0x10c   : > { %v2361_v42 = vunpack.i.h.bf16 %v2359_v5  ;;  %v2360_v30 = vunpack.i.l.bf16 %v2359_v5 }
 0x10e   : > { %v1168_v7 = vsel %vm1163_vm10, %v1143_v53, %v2360_v30  ;;  %v1169_v56 = vsel %vm1163_vm10, %v1144_v32, %v2361_v42  ;;  %v2374_v58 = vpop.permute.xlu1 %2373  ;;  %v2346_v32 = vunpack.i.h.bf16 %v3742_v60 }
 0x10f   : > { %v1190_v1 = vpack.c.bf16 %v1169_v56, %v1168_v7  ;;  %v2376_v63 = vunpack.i.h.bf16 %v2374_v58  ;;  %v2375_v29 = vunpack.i.l.bf16 %v2374_v58  ;;  %v2369_v23 = vpop.permute.xlu0 %2368  ;;  %v2366_v56 = vunpack.i.h.bf16 %v3778_v24 }
 0x110   : > { %v2371_v12 = vunpack.i.h.bf16 %v2369_v23  ;;  %v2370_v9 = vunpack.i.l.bf16 %v2369_v23  ;;  %v2365_v58 = vunpack.i.l.bf16 %v3778_v24 }
 0x111   : > { %v1170_v57 = vsel %vm1163_vm10, %v1145_v34, %v2375_v29  ;;  %v1171_v49 = vsel %vm1163_vm10, %v1146_v46, %v2376_v63  ;;  %1993 = vmatprep.mubr.msk.bf16.mxu0 %vm1213_vm11, %v1190_v1  ;;  %v2650_v1 = vld [vmem:[%s2819_s10 + $0x98] sm:$0xff]  ;;  %v2651_v29 = vld [vmem:[%s2819_s10 + $0x90] sm:$0xff] }
 0x112   : > { %v1191_v4 = vpack.c.bf16 %v1171_v49, %v1170_v57  ;;  %v2384_v35 = vpop.permute.xlu1 %2383  ;;  %v1105_v54 = vsel %vm1088_vm7, %v1080_v38, %v2370_v9  ;;  %v1106_v47 = vsel %vm1088_vm7, %v1081_v55, %v2371_v12  ;;  %v1008_v63 = vsel %vm988_vm3, %v2650_v1, %v2116_v37 }
 0x113   : > { %v3798_v2 = vpop.permute.xlu0 %2378  ;;  %v2386_v14 = vunpack.i.h.bf16 %v2384_v35  ;;  %v2385_v20 = vunpack.i.l.bf16 %v2384_v35  ;;  %v1007_v23 = vsel %vm988_vm3, %v2651_v29, %v2115_v44  ;;  %v1033_v49 = vsel %vm1013_vm4, %v1008_v63, %v2325_v25 }
 0x114   : > { %1994 = vmatmul.mubr.msk.bf16.gmra.mxu0 %vm1213_vm11, %v1191_v4  ;;  %v2381_v34 = vunpack.i.h.bf16 %v3798_v2  ;;  %v2380_v60 = vunpack.i.l.bf16 %v3798_v2  ;;  %v1032_v57 = vsel %vm1013_vm4, %v1007_v23, %v2311_v41  ;;  %v1058_v59 = vsel %vm1038_vm5, %v1033_v49, %v2346_v32 }
 0x115   : > { %v1130_v18 = vsel %vm1113_vm8, %v1105_v54, %v2385_v20  ;;  %v1131_v52 = vsel %vm1113_vm8, %v1106_v47, %v2386_v14  ;;  %v1057_v35 = vsel %vm1038_vm5, %v1032_v57, %v2345_v62  ;;  %v1083_v31 = vsel %vm1063_vm6, %v1058_v59, %v2366_v56  ;;  %v2656_v59 = vld [vmem:[%s2819_s10 + $0xb8] sm:$0xff] }
 0x116   : > { %v3801_v3 = vpop.permute.xlu1 %2393  ;;  %v1082_v2 = vsel %vm1063_vm6, %v1057_v35, %v2365_v58  ;;  %v1108_v21 = vsel %vm1088_vm7, %v1083_v31, %v2381_v34  ;;  %v2096_v55 = vunpack.i.h.bf16 %v3423_v45  ;;  %v2095_v37 = vunpack.i.l.bf16 %v3423_v45  ;;  %v2654_v45 = vld [vmem:[%s2819_s10 + $0x48] sm:$0xff] }
 0x117   : > { %v3803_v33 = vpop.permute.xlu0 %2388  ;;  %v1107_v36 = vsel %vm1088_vm7, %v1082_v2, %v2380_v60  ;;  %v2091_v54 = vunpack.i.h.bf16 %v3425_v27  ;;  %v2090_v47 = vunpack.i.l.bf16 %v3425_v27  ;;  %v2326_v41 = vunpack.i.h.bf16 %v3727_v10  ;;  %v4357_v58 = vld [vmem:[#allocation13_spill] sm:$0xff] }
 0x118   : > { %v2396_v32 = vunpack.i.h.bf16 %v3801_v3  ;;  %v2395_v62 = vunpack.i.l.bf16 %v3801_v3  ;;  %v2120_v1 = vunpack.i.l.bf16 %v4357_v58 }
 0x11a   : > { %v2404_v13 = vpop.permute.xlu1 %2403 }
 0x11b   : > { %v3807_v11 = vpop.permute.xlu0 %2398  ;;  %v2406_v17 = vunpack.i.h.bf16 %v2404_v13  ;;  %v2405_v16 = vunpack.i.l.bf16 %v2404_v13 }
 0x11c   : > { %v2401_v24 = vunpack.i.h.bf16 %v3807_v11  ;;  %v2400_v4 = vunpack.i.l.bf16 %v3807_v11 }
 0x11d   : > { %v1155_v48 = vsel %vm1138_vm9, %v1130_v18, %v2405_v16  ;;  %v1156_v53 = vsel %vm1138_vm9, %v1131_v52, %v2406_v17  ;;  %v2652_v18 = vld [vmem:[%s2819_s10 + $0x58] sm:$0xff] }
 0x11e   : > { %v3815_v40 = vpop.permute.xlu1 %2413  ;;  %v1132_v11 = vsel %vm1113_vm8, %v1107_v36, %v2400_v4  ;;  %v1133_v6 = vsel %vm1113_vm8, %v1108_v21, %v2401_v24  ;;  %v3883_v52 = vsel %vm988_vm3, %v2652_v18, %v2096_v55  ;;  %v2391_v21 = vunpack.i.h.bf16 %v3803_v33 }
 0x11f   : > { %v3818_v22 = vpop.permute.xlu0 %2408  ;;  %v2415_v10 = vunpack.i.l.bf16 %v3815_v40  ;;  %v2390_v36 = vunpack.i.l.bf16 %v3803_v33 }
 0x122   : > { %v2424_v5 = vpop.permute.xlu1 %2423 }
 0x123   : > { %v2426_v15 = vunpack.i.h.bf16 %v2424_v5  ;;  %v2425_v42 = vunpack.i.l.bf16 %v2424_v5  ;;  %v2419_v30 = vpop.permute.xlu0 %2418 }
 0x124   : > { %v2421_v13 = vunpack.i.h.bf16 %v2419_v30  ;;  %v2420_v51 = vunpack.i.l.bf16 %v2419_v30  ;;  %v2150_v30 = vunpack.i.l.bf16 %v3483_v19  ;;  %v2416_v19 = vunpack.i.h.bf16 %v3815_v40 }
 0x125   : > { %v1180_v61 = vsel %vm1163_vm10, %v1155_v48, %v2425_v42  ;;  %v1181_v7 = vsel %vm1163_vm10, %v1156_v53, %v2426_v15  ;;  %v2653_v15 = vld [vmem:[%s2819_s10 + $0x50] sm:$0xff]  ;;  %v998_v48 = vsel %vm988_vm3, %v2654_v45, %v2091_v54  ;;  %v2655_v53 = vld [vmem:[%s2819_s10 + $0x40] sm:$0xff] }
 0x126   : > { %v1196_v50 = vpack.c.bf16 %v1181_v7, %v1180_v61  ;;  %v3841_v28 = vpop.permute.xlu1 %2433  ;;  %v1157_v0 = vsel %vm1138_vm9, %v1132_v11, %v2420_v51  ;;  %v1158_v14 = vsel %vm1138_vm9, %v1133_v6, %v2421_v13  ;;  %v999_v42 = vsel %vm988_vm3, %v2653_v15, %v2095_v37  ;;  %v4356_v61 = vld [vmem:[#allocation21_spill] sm:$0xff]  ;;  %v2659_v45 = vld [vmem:[%s2819_s10 + $0xa0] sm:$0xff] }
 0x127   : > { %v3849_v46 = vpop.permute.xlu0 %2428  ;;  %v997_v27 = vsel %vm988_vm3, %v2655_v53, %v2090_v47  ;;  %v2126_v7 = vunpack.i.h.bf16 %v4356_v61  ;;  %v2125_v56 = vunpack.i.l.bf16 %v4356_v61  ;;  %v2436_v63 = vunpack.i.h.bf16 %v3841_v28 }
 0x128   : > { %2005 = vmatprep.mubr.msk.bf16.mxu1 %vm1213_vm11, %v1196_v50  ;;  %v2121_v50 = vunpack.i.h.bf16 %v4357_v58  ;;  %v2435_v29 = vunpack.i.l.bf16 %v3841_v28  ;;  %v1022_v3 = vsel %vm1013_vm4, %v997_v27, %v2150_v30  ;;  %v1023_v34 = vsel %vm1013_vm4, %v998_v48, %v2326_v41  ;;  %v2657_v28 = vld [vmem:[%s2819_s10 + $0xb0] sm:$0xff] }
 0x129   : > { %v1047_v40 = vsel %vm1038_vm5, %v1022_v3, %v2395_v62  ;;  %v1048_v24 = vsel %vm1038_vm5, %v1023_v34, %v2396_v32  ;;  %v3915_v13 = vsel %vm988_vm3, %v2656_v59, %v2126_v7  ;;  %v3919_v51 = vsel %vm988_vm3, %v2657_v28, %v2125_v56 }
 0x12a   : > { %v3860_v39 = vpop.permute.xlu1 %2443  ;;  %v1072_v2 = vsel %vm1063_vm6, %v1047_v40, %v2415_v10  ;;  %v1073_v31 = vsel %vm1063_vm6, %v1048_v24, %v2416_v19  ;;  %v2431_v55 = vunpack.i.h.bf16 %v3849_v46  ;;  %v2430_v37 = vunpack.i.l.bf16 %v3849_v46 }
 0x12b   : > { %v2439_v43 = vpop.permute.xlu0 %2438  ;;  %v1098_v11 = vsel %vm1088_vm7, %v1073_v31, %v2436_v63  ;;  %v2445_v15 = vunpack.i.l.bf16 %v3860_v39  ;;  %v1009_v48 = vsel %vm988_vm3, %v2659_v45, %v2120_v1  ;;  %v1025_v46 = vsel %vm1013_vm4, %v3883_v52, %v2391_v21 }
 0x12c   : > { %v2441_v12 = vunpack.i.h.bf16 %v2439_v43  ;;  %v2440_v9 = vunpack.i.l.bf16 %v2439_v43  ;;  %v1097_v43 = vsel %vm1088_vm7, %v1072_v2, %v2435_v29  ;;  %v1024_v53 = vsel %vm1013_vm4, %v999_v42, %v2390_v36 }
 0x12d   : > { %v2446_v42 = vunpack.i.h.bf16 %v3860_v39 }
 0x12e   : > { %v1182_v20 = vsel %vm1163_vm10, %v1157_v0, %v2440_v9  ;;  %v1183_v8 = vsel %vm1163_vm10, %v1158_v14, %v2441_v12  ;;  %v2454_v26 = vpop.permute.xlu1 %2453 }
 0x12f   : > { %v1197_v17 = vpack.c.bf16 %v1183_v8, %v1182_v20  ;;  %v3870_v16 = vpop.permute.xlu0 %2448  ;;  %v2456_v60 = vunpack.i.h.bf16 %v2454_v26  ;;  %v2455_v57 = vunpack.i.l.bf16 %v2454_v26  ;;  %v2411_v8 = vunpack.i.h.bf16 %v3818_v22 }
 0x130   : > { %v2410_v26 = vunpack.i.l.bf16 %v3818_v22  ;;  %v2450_v30 = vunpack.i.l.bf16 %v3870_v16  ;;  %v2451_v27 = vunpack.i.h.bf16 %v3870_v16  ;;  %v1034_v16 = vsel %vm1013_vm4, %v1009_v48, %v2445_v15 }
 0x131   : > { %2006 = vmatmul.mubr.msk.bf16.gmra.mxu1 %vm1213_vm11, %v1197_v17  ;;  %v1122_v12 = vsel %vm1113_vm8, %v1097_v43, %v2455_v57  ;;  %v1123_v9 = vsel %vm1113_vm8, %v1098_v11, %v2456_v60  ;;  %v1050_v61 = vsel %vm1038_vm5, %v1025_v46, %v2411_v8 }
 0x132   : > { %v3873_v38 = vpop.permute.xlu1 %2463  ;;  %v1049_v62 = vsel %vm1038_vm5, %v1024_v53, %v2410_v26  ;;  %v1075_v10 = vsel %vm1063_vm6, %v1050_v61, %v2431_v55 }
 0x133   : > { %v3877_v44 = vpop.permute.xlu0 %2458  ;;  %v1074_v19 = vsel %vm1063_vm6, %v1049_v62, %v2430_v37  ;;  %v2465_v1 = vunpack.i.l.bf16 %v3873_v38  ;;  %v1100_v29 = vsel %vm1088_vm7, %v1075_v10, %v2451_v27 }
 0x134   : > { %v2461_v3 = vunpack.i.h.bf16 %v3877_v44  ;;  %v2460_v34 = vunpack.i.l.bf16 %v3877_v44 }
 0x135   : > { %v1059_v2 = vsel %vm1038_vm5, %v1034_v16, %v2465_v1 }
 0x136   : > { %v2474_v5 = vpop.permute.xlu1 %2473 }
 0x137   : > { %v3889_v25 = vpop.permute.xlu0 %2468  ;;  %v2476_v4 = vunpack.i.h.bf16 %v2474_v5  ;;  %v2475_v35 = vunpack.i.l.bf16 %v2474_v5  ;;  %v2658_v5 = vld [vmem:[%s2819_s10 + $0xa8] sm:$0xff] }
 0x138   : > { %v1010_v18 = vsel %vm988_vm3, %v2658_v5, %v2121_v50  ;;  %v2471_v7 = vunpack.i.h.bf16 %v3889_v25  ;;  %v2470_v56 = vunpack.i.l.bf16 %v3889_v25  ;;  %v1099_v50 = vsel %vm1088_vm7, %v1074_v19, %v2450_v30 }
 0x139   : > { %v1147_v33 = vsel %vm1138_vm9, %v1122_v12, %v2475_v35  ;;  %v1148_v17 = vsel %vm1138_vm9, %v1123_v9, %v2476_v4  ;;  %v2466_v25 = vunpack.i.h.bf16 %v3873_v38  ;;  %v1035_v38 = vsel %vm1013_vm4, %v1010_v18, %v2446_v42 }
 0x13a   : > { %v3905_v23 = vpop.permute.xlu1 %2483  ;;  %v1124_v57 = vsel %vm1113_vm8, %v1099_v50, %v2470_v56  ;;  %v1125_v39 = vsel %vm1113_vm8, %v1100_v29, %v2471_v7  ;;  %v1037_v12 = vsel %vm1013_vm4, %v3915_v13, %v2461_v3  ;;  %v1036_v9 = vsel %vm1013_vm4, %v3919_v51, %v2460_v34 }
 0x13b   : > { %v3909_v49 = vpop.permute.xlu0 %2478  ;;  %v2486_v4 = vunpack.i.h.bf16 %v3905_v23  ;;  %v2485_v35 = vunpack.i.l.bf16 %v3905_v23  ;;  %v1060_v36 = vsel %vm1038_vm5, %v1035_v38, %v2466_v25  ;;  %vm1841_vm3 = vcmask 1045509  }
 0x13c   : > { %v2481_v43 = vunpack.i.h.bf16 %v3909_v49  ;;  %v2480_v11 = vunpack.i.l.bf16 %v3909_v49  ;;  %vm1843_vm4 = vcmask 1046534  }
 0x13d   : > { %v1085_v8 = vsel %vm1063_vm6, %v1060_v36, %v2486_v4 }
 0x13e   : > { %v2494_v6 = vpop.permute.xlu1 %2493  ;;  %v1062_v51 = vsel %vm1038_vm5, %v1037_v12, %v2481_v43 }
 0x13f   : > { %v2496_v0 = vunpack.i.h.bf16 %v2494_v6  ;;  %v2495_v14 = vunpack.i.l.bf16 %v2494_v6  ;;  %v2489_v20 = vpop.permute.xlu0 %2488 }
 0x140   : > { %v2491_v52 = vunpack.i.h.bf16 %v2489_v20  ;;  %v2490_v58 = vunpack.i.l.bf16 %v2489_v20  ;;  %v1084_v20 = vsel %vm1063_vm6, %v1059_v2, %v2485_v35 }
 0x141   : > { %v1172_v54 = vsel %vm1163_vm10, %v1147_v33, %v2495_v14  ;;  %v1173_v47 = vsel %vm1163_vm10, %v1148_v17, %v2496_v0 }
 0x142   : > { %v1192_v22 = vpack.c.bf16 %v1173_v47, %v1172_v54  ;;  %v3941_v41 = vpop.permute.xlu1 %2503  ;;  %v1149_v59 = vsel %vm1138_vm9, %v1124_v57, %v2490_v58  ;;  %v1150_v28 = vsel %vm1138_vm9, %v1125_v39, %v2491_v52  ;;  %v1061_v54 = vsel %vm1038_vm5, %v1036_v9, %v2480_v11 }
 0x143   : > { %v2499_v32 = vpop.permute.xlu0 %2498  ;;  %v2506_v49 = vunpack.i.h.bf16 %v3941_v41  ;;  %v2505_v17 = vunpack.i.l.bf16 %v3941_v41  ;;  %vm1845_vm5 = vcmask 1047559  }
 0x144   : > { %1997 = vmatprep.mubr.msk.bf16.mxu0 %vm1213_vm11, %v1192_v22  ;;  %v2501_v0 = vunpack.i.h.bf16 %v2499_v32  ;;  %v2500_v14 = vunpack.i.l.bf16 %v2499_v32 }
 0x145   : > { %v1109_v27 = vsel %vm1088_vm7, %v1084_v20, %v2505_v17  ;;  %v1110_v32 = vsel %vm1088_vm7, %v1085_v8, %v2506_v49 }
 0x146   : > { %v2514_v63 = vpop.permute.xlu1 %2513  ;;  %v1086_v15 = vsel %vm1063_vm6, %v1061_v54, %v2500_v14  ;;  %v1087_v30 = vsel %vm1063_vm6, %v1062_v51, %v2501_v0  ;;  %v2731_v14 = vmov 0  }
 0x147   : > { %v2509_v60 = vpop.permute.xlu0 %2508  ;;  %v2516_v26 = vunpack.i.h.bf16 %v2514_v63  ;;  %v2515_v33 = vunpack.i.l.bf16 %v2514_v63  ;;  %2547 = vset.pattern.permute.xlu1 %v2731_v14  ;;  %2548 = vset.pattern.permute.xlu0 %v2731_v14 }
 0x148   : > { %v2511_v40 = vunpack.i.h.bf16 %v2509_v60  ;;  %v2510_v24 = vunpack.i.l.bf16 %v2509_v60 }
 0x149   : > { %v1111_v48 = vsel %vm1088_vm7, %v1086_v15, %v2515_v33  ;;  %v1112_v41 = vsel %vm1088_vm7, %v1087_v30, %v2516_v26 }
 0x14a   : > { %v1174_v44 = vsel %vm1163_vm10, %v1149_v59, %v2510_v24  ;;  %v1175_v31 = vsel %vm1163_vm10, %v1150_v28, %v2511_v40  ;;  %v2524_v21 = vpop.permute.xlu1 %2523  ;;  %v4011_v40 = vld [vmem:[%s4216_s2] ss:$0 sm:$0xff] }
 0x14b   : > { %v1193_v23 = vpack.c.bf16 %v1175_v31, %v1174_v44  ;;  %v2519_v6 = vpop.permute.xlu0 %2518  ;;  %v2526_v55 = vunpack.i.h.bf16 %v2524_v21  ;;  %v2525_v37 = vunpack.i.l.bf16 %v2524_v21  ;;  %v4017_v59 = vld [vmem:[%s4217_s3] ss:$0 sm:$0xff] }
 0x14c   : > { %v2521_v47 = vunpack.i.h.bf16 %v2519_v6  ;;  %v2520_v5 = vunpack.i.l.bf16 %v2519_v6 }
 0x14d   : > { %1998 = vmatmul.mubr.msk.bf16.gmra.mxu0 %vm1213_vm11, %v1193_v23  ;;  %v1136_v62 = vsel %vm1113_vm8, %v1111_v48, %v2525_v37  ;;  %v1137_v61 = vsel %vm1113_vm8, %v1112_v41, %v2526_v55 }
 0x14e   : > { %v2534_v13 = vpop.permute.xlu1 %2533  ;;  %v1134_v56 = vsel %vm1113_vm8, %v1109_v27, %v2520_v5  ;;  %v1135_v19 = vsel %vm1113_vm8, %v1110_v32, %v2521_v47 }
 0x14f   : > { %v2529_v18 = vpop.permute.xlu0 %2528  ;;  %v2536_v22 = vunpack.i.h.bf16 %v2534_v13  ;;  %v2535_v45 = vunpack.i.l.bf16 %v2534_v13 }
 0x150   : > { %v2531_v46 = vunpack.i.h.bf16 %v2529_v18  ;;  %v2530_v53 = vunpack.i.l.bf16 %v2529_v18 }
 0x151   : > { %v1161_v42 = vsel %vm1138_vm9, %v1136_v62, %v2535_v45  ;;  %v1162_v16 = vsel %vm1138_vm9, %v1137_v61, %v2536_v22 }
 0x152   : > { %v2544_v7 = vpop.permute.xlu1 %2543  ;;  %v1159_v63 = vsel %vm1138_vm9, %v1134_v56, %v2530_v53  ;;  %v1160_v29 = vsel %vm1138_vm9, %v1135_v19, %v2531_v46 }
 0x153   : > { %v2546_v10 = vunpack.i.h.bf16 %v2544_v7  ;;  %v2545_v52 = vunpack.i.l.bf16 %v2544_v7  ;;  %v2539_v58 = vpop.permute.xlu0 %2538 }
 0x154   : > { %v2541_v50 = vunpack.i.h.bf16 %v2539_v58  ;;  %v2540_v1 = vunpack.i.l.bf16 %v2539_v58 }
 0x155   : > { %v1186_v25 = vsel %vm1163_vm10, %v1161_v42, %v2545_v52  ;;  %v1187_v3 = vsel %vm1163_vm10, %v1162_v16, %v2546_v10 }
 0x156   : > { %v1199_v34 = vpack.c.bf16 %v1187_v3, %v1186_v25  ;;  %v1184_v60 = vsel %vm1163_vm10, %v1159_v63, %v2540_v1  ;;  %v1185_v57 = vsel %vm1163_vm10, %v1160_v29, %v2541_v50 }
 0x157   : > { %v1198_v39 = vpack.c.bf16 %v1185_v57, %v1184_v60 }
 0x159   : > { %2009 = vmatprep.mubr.msk.bf16.mxu1 %vm1213_vm11, %v1198_v39 }
 0x15a   : > { %2010 = vmatmul.mubr.msk.bf16.gmra.mxu1 %vm1213_vm11, %v1199_v34 }
 0x1a0   : > { %v1991_v24 = vpop.f32.mrf.mxu0 }
 0x1a1   : > { %v1299_v4 = vadd.f32 %v1991_v24, %v4011_v40 }
 0x1a2   : > { %v1290_v35 = vpop.f32.mrf.mxu0 }
 0x1a3   : > { %v1387_v28 = vmax.f32 %v1299_v4, 0.0  ;;  %v1291_v38 = vadd.f32 %v4011_v40, %v1290_v35 }
 0x1a4   : > { %v1992_v2 = vpop.f32.mrf.mxu0 }
 0x1a5   : > { %v1385_v44 = vmax.f32 %v1291_v38, 0.0  ;;  %v1302_v31 = vadd.f32 %v1992_v2, %v4011_v40  ;;  %v1418_v21 = vmul.f32 %v4017_v59, %v1387_v28 }
 0x1a6   : > { %v1293_v9 = vpop.f32.mrf.mxu0 }
 0x1a7   : > { %v1388_v36 = vmax.f32 %v1302_v31, 0.0  ;;  %v1447_v43 = vsel %vm1440_vm12, %v1418_v21, 0.0  ;;  %v1416_v11 = vmul.f32 %v4017_v59, %v1385_v44  ;;  %v1294_v8 = vadd.f32 %v4011_v40, %v1293_v9 }
 0x1a8   : > { %1448 = vadd.xlane.f32.xlu1 %v1447_v43 }
 0x1a9   : > { %v1419_v23 = vmul.f32 %v4017_v59, %v1388_v36  ;;  %v1441_v6 = vsel %vm1440_vm12, %v1416_v11, 0.0  ;;  %v1386_v54 = vmax.f32 %v1294_v8, 0.0 }
 0x1aa   : > { %1442 = vadd.xlane.f32.xlu0 %v1441_v6 }
 0x1ab   : > { %v1450_v12 = vsel %vm1440_vm12, %v1419_v23, 0.0  ;;  %v1417_v45 = vmul.f32 %v4017_v59, %v1386_v54 }
 0x1ad   : > { %v1444_v53 = vsel %vm1440_vm12, %v1417_v45, 0.0 }
 0x1ae   : > { %1451 = vadd.xlane.f32.xlu0 %v1450_v12 }
 0x1b8   : > { %v2003_v0 = vpop.f32.mrf.mxu1 }
 0x1b9   : > { %v1347_v20 = vadd.f32 %v2003_v0, %v4011_v40 }
 0x1ba   : > { %v1338_v26 = vpop.f32.mrf.mxu1 }
 0x1bb   : > { %v1399_v33 = vmax.f32 %v1347_v20, 0.0  ;;  %v1339_v49 = vadd.f32 %v4011_v40, %v1338_v26 }
 0x1bc   : > { %v2004_v17 = vpop.f32.mrf.mxu1 }
 0x1bd   : > { %v1430_v55 = vmul.f32 %v4017_v59, %v1399_v33  ;;  %v1397_v37 = vmax.f32 %v1339_v49, 0.0  ;;  %v1350_v13 = vadd.f32 %v2004_v17, %v4011_v40 }
 0x1be   : > { %v1341_v51 = vpop.f32.mrf.mxu1 }
 0x1bf   : > { %v1428_v47 = vmul.f32 %v4017_v59, %v1397_v37  ;;  %v1400_v5 = vmax.f32 %v1350_v13, 0.0  ;;  %v1342_v18 = vadd.f32 %v4011_v40, %v1341_v51  ;;  %v1483_v15 = vsel %vm1440_vm12, %v1430_v55, 0.0 }
 0x1c0   : > { %1484 = vadd.xlane.f32.xlu1 %v1483_v15 }
 0x1c1   : > { %v1431_v30 = vmul.f32 %v4017_v59, %v1400_v5  ;;  %v1398_v22 = vmax.f32 %v1342_v18, 0.0  ;;  %v1477_v41 = vsel %vm1440_vm12, %v1428_v47, 0.0 }
 0x1c3   : > { %v1429_v48 = vmul.f32 %v4017_v59, %v1398_v22  ;;  %v1486_v46 = vsel %vm1440_vm12, %v1431_v30, 0.0 }
 0x1c4   : > { %1478 = vadd.xlane.f32.xlu1 %v1477_v41  ;;  %1487 = vadd.xlane.f32.xlu0 %v1486_v46 }
 0x1c5   : > { %v1480_v27 = vsel %vm1440_vm12, %v1429_v48, 0.0 }
 0x1c8   : > { %1445 = vadd.xlane.f32.xlu1 %v1444_v53  ;;  %1481 = vadd.xlane.f32.xlu0 %v1480_v27 }
 0x1d4   : > { %v1995_v32 = vpop.f32.mrf.mxu0 }
 0x1d5   : > { %v1315_v62 = vadd.f32 %v1995_v32, %v4011_v40 }
 0x1d6   : > { %v1306_v61 = vpop.f32.mrf.mxu0 }
 0x1d7   : > { %v1391_v7 = vmax.f32 %v1315_v62, 0.0  ;;  %v1307_v56 = vadd.f32 %v4011_v40, %v1306_v61 }
 0x1d8   : > { %v1996_v19 = vpop.f32.mrf.mxu0 }
 0x1d9   : > { %v1422_v10 = vmul.f32 %v4017_v59, %v1391_v7  ;;  %v1389_v52 = vmax.f32 %v1307_v56, 0.0  ;;  %v1318_v58 = vadd.f32 %v1996_v19, %v4011_v40 }
 0x1da   : > { %v1309_v25 = vpop.f32.mrf.mxu0 }
 0x1db   : > { %v1420_v42 = vmul.f32 %v4017_v59, %v1389_v52  ;;  %v1392_v16 = vmax.f32 %v1318_v58, 0.0  ;;  %v1459_v50 = vsel %vm1440_vm12, %v1422_v10, 0.0  ;;  %v1310_v60 = vadd.f32 %v4011_v40, %v1309_v25 }
 0x1dc   : > { %1460 = vadd.xlane.f32.xlu1 %v1459_v50 }
 0x1dd   : > { %v1423_v1 = vmul.f32 %v4017_v59, %v1392_v16  ;;  %v1453_v63 = vsel %vm1440_vm12, %v1420_v42, 0.0  ;;  %v1390_v2 = vmax.f32 %v1310_v60, 0.0 }
 0x1de   : > { %1454 = vadd.xlane.f32.xlu0 %v1453_v63 }
 0x1df   : > { %v1462_v29 = vsel %vm1440_vm12, %v1423_v1, 0.0  ;;  %v1421_v23 = vmul.f32 %v4017_v59, %v1390_v2 }
 0x1e1   : > { %v1456_v14 = vsel %vm1440_vm12, %v1421_v23, 0.0 }
 0x1e2   : > { %1463 = vadd.xlane.f32.xlu0 %v1462_v29 }
 0x1f1   : > { %v2007_v3 = vpop.f32.mrf.mxu1 }
 0x1f2   : > { %v1363_v34 = vadd.f32 %v2007_v3, %v4011_v40 }
 0x1f3   : > { %v1354_v57 = vpop.f32.mrf.mxu1 }
 0x1f4   : > { %v1403_v39 = vmax.f32 %v1363_v34, 0.0  ;;  %v1355_v24 = vadd.f32 %v4011_v40, %v1354_v57  ;;  %v1942_v34 = vld [vmem:[#allocation2] ss:$0 sm:$0xff] }
 0x1f5   : > { %v2008_v4 = vpop.f32.mrf.mxu1 }
 0x1f6   : > { %v1434_v35 = vmul.f32 %v4017_v59, %v1403_v39  ;;  %v1401_v28 = vmax.f32 %v1355_v24, 0.0  ;;  %v1366_v38 = vadd.f32 %v2008_v4, %v4011_v40 }
 0x1f7   : > { %v1357_v44 = vpop.f32.mrf.mxu1 }
 0x1f8   : > { %v1432_v31 = vmul.f32 %v4017_v59, %v1401_v28  ;;  %v1404_v21 = vmax.f32 %v1366_v38, 0.0  ;;  %v1358_v36 = vadd.f32 %v4011_v40, %v1357_v44  ;;  %v1495_v43 = vsel %vm1440_vm12, %v1434_v35, 0.0 }
 0x1f9   : > { %1496 = vadd.xlane.f32.xlu1 %v1495_v43 }
 0x1fa   : > { %v1435_v11 = vmul.f32 %v4017_v59, %v1404_v21  ;;  %v1402_v6 = vmax.f32 %v1358_v36, 0.0  ;;  %v1489_v12 = vsel %vm1440_vm12, %v1432_v31, 0.0 }
 0x1fc   : > { %v1498_v9 = vsel %vm1440_vm12, %v1435_v11, 0.0  ;;  %v1433_v0 = vmul.f32 %v4017_v59, %v1402_v6 }
 0x1fd   : > { %1490 = vadd.xlane.f32.xlu1 %v1489_v12  ;;  %1499 = vadd.xlane.f32.xlu0 %v1498_v9 }
 0x1fe   : > { %v1492_v20 = vsel %vm1440_vm12, %v1433_v0, 0.0 }
 0x201   : > { %1457 = vadd.xlane.f32.xlu0 %v1456_v14 }
 0x205   : > { %1493 = vadd.xlane.f32.xlu0 %v1492_v20 }
 0x20d   : > { %v1999_v8 = vpop.f32.mrf.mxu0 }
 0x20e   : > { %v1331_v26 = vadd.f32 %v1999_v8, %v4011_v40 }
 0x20f   : > { %v1322_v33 = vpop.f32.mrf.mxu0 }
 0x210   : > { %v1395_v49 = vmax.f32 %v1331_v26, 0.0  ;;  %v1323_v22 = vadd.f32 %v4011_v40, %v1322_v33 }
 0x211   : > { %v2000_v17 = vpop.f32.mrf.mxu0 }
 0x212   : > { %v1426_v55 = vmul.f32 %v4017_v59, %v1395_v49  ;;  %v1334_v37 = vadd.f32 %v2000_v17, %v4011_v40  ;;  %v1393_v53 = vmax.f32 %v1323_v22, 0.0 }
 0x213   : > { %v1325_v13 = vpop.f32.mrf.mxu0 }
 0x214   : > { %v1396_v54 = vmax.f32 %v1334_v37, 0.0  ;;  %v1326_v51 = vadd.f32 %v4011_v40, %v1325_v13  ;;  %v1471_v47 = vsel %vm1440_vm12, %v1426_v55, 0.0  ;;  %v1424_v19 = vmul.f32 %v4017_v59, %v1393_v53 }
 0x215   : > { %1472 = vadd.xlane.f32.xlu1 %v1471_v47 }
 0x216   : > { %v1427_v5 = vmul.f32 %v4017_v59, %v1396_v54  ;;  %v1394_v18 = vmax.f32 %v1326_v51, 0.0  ;;  %v1465_v63 = vsel %vm1440_vm12, %v1424_v19, 0.0 }
 0x218   : > { %v1425_v15 = vmul.f32 %v4017_v59, %v1394_v18  ;;  %v1474_v30 = vsel %vm1440_vm12, %v1427_v5, 0.0 }
 0x219   : > { %1475 = vadd.xlane.f32.xlu0 %v1474_v30 }
 0x21a   : > { %v2011_v45 = vpop.f32.mrf.mxu1  ;;  %v1468_v46 = vsel %vm1440_vm12, %v1425_v15, 0.0 }
 0x21b   : > { %v1379_v48 = vadd.f32 %v2011_v45, %v4011_v40 }
 0x21c   : > { %v1370_v41 = vpop.f32.mrf.mxu1 }
 0x21d   : > { %v1407_v27 = vmax.f32 %v1379_v48, 0.0  ;;  %v1371_v32 = vadd.f32 %v4011_v40, %v1370_v41  ;;  %1469 = vadd.xlane.f32.xlu0 %v1468_v46 }
 0x21e   : > { %v2012_v62 = vpop.f32.mrf.mxu1 }
 0x21f   : > { %v1438_v61 = vmul.f32 %v4017_v59, %v1407_v27  ;;  %v1382_v7 = vadd.f32 %v2012_v62, %v4011_v40  ;;  %v1405_v10 = vmax.f32 %v1371_v32, 0.0 }
 0x220   : > { %v1373_v56 = vpop.f32.mrf.mxu1 }
 0x221   : > { %v1374_v52 = vadd.f32 %v4011_v40, %v1373_v56  ;;  %v1507_v58 = vsel %vm1440_vm12, %v1438_v61, 0.0  ;;  %v1408_v42 = vmax.f32 %v1382_v7, 0.0  ;;  %v1436_v50 = vmul.f32 %v4017_v59, %v1405_v10 }
 0x222   : > { %1508 = vadd.xlane.f32.xlu1 %v1507_v58 }
 0x223   : > { %v1406_v16 = vmax.f32 %v1374_v52, 0.0  ;;  %v1439_v29 = vmul.f32 %v4017_v59, %v1408_v42  ;;  %v1501_v3 = vsel %vm1440_vm12, %v1436_v50, 0.0 }
 0x225   : > { %v1437_v1 = vmul.f32 %v4017_v59, %v1406_v16  ;;  %v1510_v40 = vsel %vm1440_vm12, %v1439_v29, 0.0 }
 0x226   : > { %1466 = vadd.xlane.f32.xlu1 %v1465_v63 }
 0x227   : > { %v1504_v25 = vsel %vm1440_vm12, %v1437_v1, 0.0 }
 0x228   : > { %1505 = vadd.xlane.f32.xlu0 %v1504_v25 }
 0x22a   : > { %1502 = vadd.xlane.f32.xlu1 %v1501_v3 }
 0x22c   : > { %1511 = vadd.xlane.f32.xlu0 %v1510_v40 }
 0x231   : > { %v1449_v60 = vpop.xlane.xlu1 %1448 }
 0x233   : > { %v1443_v39 = vpop.xlane.xlu0 %1442 }
 0x237   : > { %v1452_v4 = vpop.xlane.xlu0 %1451 }
 0x23b   : > { %1520 = vperm.xlu1 %2547, %v1942_v34  }
 0x249   : > { %v1485_v57 = vpop.xlane.xlu1 %1484 }
 0x24d   : > { %v1479_v24 = vpop.xlane.xlu1 %1478  ;;  %v1488_v28 = vpop.xlane.xlu0 %1487 }
 0x251   : > { %v1446_v35 = vpop.xlane.xlu1 %1445  ;;  %v1482_v59 = vpop.xlane.xlu0 %1481 }
 0x265   : > { %v1461_v38 = vpop.xlane.xlu1 %1460 }
 0x267   : > { %v1455_v44 = vpop.xlane.xlu0 %1454 }
 0x26b   : > { %v1464_v21 = vpop.xlane.xlu0 %1463 }
 0x282   : > { %v1497_v2 = vpop.xlane.xlu1 %1496 }
 0x286   : > { %v1491_v31 = vpop.xlane.xlu1 %1490  ;;  %v1500_v43 = vpop.xlane.xlu0 %1499 }
 0x28a   : > { %v1458_v6 = vpop.xlane.xlu0 %1457 }
 0x28e   : > { %v1494_v9 = vpop.xlane.xlu0 %1493 }
 0x29e   : > { %v1473_v36 = vpop.xlane.xlu1 %1472 }
 0x2a2   : > { %v1476_v14 = vpop.xlane.xlu0 %1475 }
 0x2a6   : > { %v1470_v5 = vpop.xlane.xlu0 %1469 }
 0x2ab   : > { %v4090_v11 = vpop.xlane.xlu1 %1508 }
 0x2af   : > { %v1467_v23 = vpop.xlane.xlu1 %1466 }
 0x2b1   : > { %v1506_v10 = vpop.xlane.xlu0 %1505 }
 0x2b3   : > { %v1503_v12 = vpop.xlane.xlu1 %1502 }
 0x2b7   : > { %v4092_v0 = vpop.permute.xlu1 %1520 }
 0x2b8   : > { %v1523_v20 = vadd.f32 %v4092_v0, %v1443_v39  ;;  %v1524_v8 = vadd.f32 %v4092_v0, %v1446_v35  ;;  %v1525_v26 = vadd.f32 %v4092_v0, %v1449_v60  ;;  %v1526_v33 = vadd.f32 %v4092_v0, %v1452_v4  ;;  %v1512_v39 = vpop.xlane.xlu0 %1511 }
 0x2b9   : > { %v1527_v49 = vadd.f32 %v4092_v0, %v1455_v44  ;;  %v1528_v17 = vadd.f32 %v4092_v0, %v1458_v6  ;;  %v1529_v55 = vadd.f32 %v4092_v0, %v1461_v38  ;;  %v1530_v51 = vadd.f32 %v4092_v0, %v1464_v21 }
 0x2ba   : > { %v1943_v37 = vmul.f32 -1.442695, %v1523_v20  ;;  %v1944_v13 = vmul.f32 -1.442695, %v1524_v8  ;;  %v1945_v54 = vmul.f32 -1.442695, %v1525_v26  ;;  %v1531_v18 = vadd.f32 %v4092_v0, %v1467_v23 }
 0x2bb   : > { %v1946_v47 = vmul.f32 -1.442695, %v1526_v33  ;;  %v1947_v15 = vmul.f32 -1.442695, %v1527_v49  ;;  %v1532_v30 = vadd.f32 %v4092_v0, %v1470_v5  ;;  %v1948_v22 = vmul.f32 -1.442695, %v1528_v17 }
 0x2bc   : > { %2549 = vpow2.f32 %v1943_v37  ;;  %v1533_v45 = vadd.f32 %v4092_v0, %v1473_v36  ;;  %v1949_v48 = vmul.f32 -1.442695, %v1529_v55  ;;  %v1534_v41 = vadd.f32 %v4092_v0, %v1476_v14 }
 0x2bd   : > { %2551 = vpow2.f32 %v1944_v13  ;;  %v1950_v46 = vmul.f32 -1.442695, %v1530_v51  ;;  %v1535_v53 = vadd.f32 %v4092_v0, %v1479_v24  ;;  %v1951_v27 = vmul.f32 -1.442695, %v1531_v18 }
 0x2be   : > { %2553 = vpow2.f32 %v1945_v54  ;;  %v1536_v32 = vadd.f32 %v4092_v0, %v1482_v59  ;;  %v1952_v62 = vmul.f32 -1.442695, %v1532_v30  ;;  %v1537_v61 = vadd.f32 %v4092_v0, %v1485_v57 }
 0x2bf   : > { %2555 = vpow2.f32 %v1946_v47  ;;  %v1953_v7 = vmul.f32 -1.442695, %v1533_v45  ;;  %v1538_v56 = vadd.f32 %v4092_v0, %v1488_v28  ;;  %v1954_v19 = vmul.f32 -1.442695, %v1534_v41 }
 0x2c0   : > { %2557 = vpow2.f32 %v1947_v15  ;;  %v1539_v52 = vadd.f32 %v4092_v0, %v1491_v31  ;;  %v1955_v58 = vmul.f32 -1.442695, %v1535_v53  ;;  %v1540_v42 = vadd.f32 %v4092_v0, %v1494_v9 }
 0x2c1   : > { %2559 = vpow2.f32 %v1948_v22  ;;  %v1956_v16 = vmul.f32 -1.442695, %v1536_v32  ;;  %v1541_v50 = vadd.f32 %v4092_v0, %v1497_v2  ;;  %v1957_v1 = vmul.f32 -1.442695, %v1537_v61 }
 0x2c2   : > { %2561 = vpow2.f32 %v1949_v48  ;;  %v1542_v63 = vadd.f32 %v4092_v0, %v1500_v43  ;;  %v1958_v29 = vmul.f32 -1.442695, %v1538_v56  ;;  %v1543_v25 = vadd.f32 %v4092_v0, %v1503_v12 }
 0x2c3   : > { %2563 = vpow2.f32 %v1950_v46  ;;  %v1959_v3 = vmul.f32 -1.442695, %v1539_v52  ;;  %v1544_v34 = vadd.f32 %v4092_v0, %v1506_v10  ;;  %v1960_v60 = vmul.f32 -1.442695, %v1540_v42 }
 0x2c4   : > { %2565 = vpow2.f32 %v1951_v27  ;;  %v1545_v24 = vadd.f32 %v4092_v0, %v4090_v11  ;;  %v1961_v4 = vmul.f32 -1.442695, %v1541_v50  ;;  %v1546_v28 = vadd.f32 %v4092_v0, %v1512_v39 }
 0x2c5   : > { %2567 = vpow2.f32 %v1952_v62  ;;  %v1962_v38 = vmul.f32 -1.442695, %v1542_v63  ;;  %v1963_v2 = vmul.f32 -1.442695, %v1543_v25  ;;  %v1964_v31 = vmul.f32 -1.442695, %v1544_v34 }
 0x2c6   : > { %2569 = vpow2.f32 %v1953_v7  ;;  %v1965_v36 = vmul.f32 -1.442695, %v1545_v24  ;;  %v1966_v23 = vmul.f32 -1.442695, %v1546_v28  ;;  %v1715_v26 = vlaneseq }
 0x2c7   : > { %2571 = vpow2.f32 %v1954_v19 }
 0x2c8   : > { %2573 = vpow2.f32 %v1955_v58  ;;  %v1716_v47 = vand.u32 127, %v1715_v26  ;;  %v1718_v48 = vshrl.u32 %v1715_v26, 7 }
 0x2c9   : > { %v2550_v40 = vpop.eup %2549  ;;  %2575 = vpow2.f32 %v1956_v16 }
 0x2ca   : > { %v2552_v57 = vpop.eup %2551  ;;  %2577 = vpow2.f32 %v1957_v1  ;;  %v1619_v6 = vadd.f32 1.0, %v2550_v40  ;;  %v1721_v53 = vadd.s32 4294967288, %v1716_v47  ;;  %v1728_v62 = vadd.s32 4294967280, %v1716_v47 }
 0x2cb   : > { %v2554_v35 = vpop.eup %2553  ;;  %2579 = vpow2.f32 %v1958_v29  ;;  %v1620_v9 = vadd.f32 1.0, %v2552_v57  ;;  %v4119_v10 = vsub.s32 %v1716_v47, %v1718_v48 }
 0x2cc   : > { %v2556_v59 = vpop.eup %2555  ;;  %2581 = vpow2.f32 %v1959_v3  ;;  %v1621_v14 = vadd.f32 1.0, %v2554_v35  ;;  %v4121_v42 = vsub.s32 %v1721_v53, %v1718_v48  ;;  %v4123_v1 = vsub.s32 %v1728_v62, %v1718_v48 }
 0x2cd   : > { %v2558_v44 = vpop.eup %2557  ;;  %2583 = vpow2.f32 %v1960_v60  ;;  %v1622_v8 = vadd.f32 1.0, %v2556_v59 }
 0x2ce   : > { %v2560_v21 = vpop.eup %2559  ;;  %2585 = vpow2.f32 %v1961_v4  ;;  %v1623_v49 = vadd.f32 1.0, %v2558_v44 }
 0x2cf   : > { %v2562_v43 = vpop.eup %2561  ;;  %2587 = vpow2.f32 %v1962_v38  ;;  %v1624_v55 = vadd.f32 1.0, %v2560_v21 }
 0x2d0   : > { %v2564_v11 = vpop.eup %2563  ;;  %2589 = vpow2.f32 %v1963_v2  ;;  %v1625_v13 = vadd.f32 1.0, %v2562_v43 }
 0x2d1   : > { %v2566_v12 = vpop.eup %2565  ;;  %2591 = vpow2.f32 %v1964_v31  ;;  %v1626_v51 = vadd.f32 1.0, %v2564_v11 }
 0x2d2   : > { %v2568_v0 = vpop.eup %2567  ;;  %2593 = vpow2.f32 %v1965_v36  ;;  %v1627_v18 = vadd.f32 1.0, %v2566_v12 }
 0x2d3   : > { %v2570_v20 = vpop.eup %2569  ;;  %2595 = vpow2.f32 %v1966_v23  ;;  %v1628_v30 = vadd.f32 1.0, %v2568_v0 }
 0x2d4   : > { %v2572_v33 = vpop.eup %2571  ;;  %2597 = vrcp.f32 %v1619_v6  ;;  %v1629_v45 = vadd.f32 1.0, %v2570_v20 }
 0x2d5   : > { %v2574_v17 = vpop.eup %2573  ;;  %2599 = vrcp.f32 %v1620_v9  ;;  %v1630_v46 = vadd.f32 1.0, %v2572_v33 }
 0x2d6   : > { %v2576_v37 = vpop.eup %2575  ;;  %2601 = vrcp.f32 %v1621_v14  ;;  %v1631_v32 = vadd.f32 1.0, %v2574_v17 }
 0x2d7   : > { %v2578_v54 = vpop.eup %2577  ;;  %2603 = vrcp.f32 %v1622_v8  ;;  %v1632_v7 = vadd.f32 1.0, %v2576_v37 }
 0x2d8   : > { %v2580_v5 = vpop.eup %2579  ;;  %2605 = vrcp.f32 %v1623_v49  ;;  %v1633_v19 = vadd.f32 1.0, %v2578_v54 }
 0x2d9   : > { %v2582_v15 = vpop.eup %2581  ;;  %2607 = vrcp.f32 %v1624_v55  ;;  %v1634_v58 = vadd.f32 1.0, %v2580_v5 }
 0x2da   : > { %v2584_v22 = vpop.eup %2583  ;;  %2609 = vrcp.f32 %v1625_v13  ;;  %v1635_v50 = vadd.f32 1.0, %v2582_v15 }
 0x2db   : > { %v2586_v41 = vpop.eup %2585  ;;  %2611 = vrcp.f32 %v1626_v51  ;;  %v1636_v29 = vadd.f32 1.0, %v2584_v22 }
 0x2dc   : > { %v2588_v27 = vpop.eup %2587  ;;  %2613 = vrcp.f32 %v1627_v18  ;;  %v1637_v3 = vadd.f32 1.0, %v2586_v41 }
 0x2dd   : > { %v2590_v61 = vpop.eup %2589  ;;  %2615 = vrcp.f32 %v1628_v30  ;;  %v1638_v60 = vadd.f32 1.0, %v2588_v27 }
 0x2de   : > { %v2592_v56 = vpop.eup %2591  ;;  %2617 = vrcp.f32 %v1629_v45  ;;  %v1639_v24 = vadd.f32 1.0, %v2590_v61 }
 0x2df   : > { %v2594_v52 = vpop.eup %2593  ;;  %2619 = vrcp.f32 %v1630_v46  ;;  %v1640_v28 = vadd.f32 1.0, %v2592_v56 }
 0x2e0   : > { %v2596_v16 = vpop.eup %2595  ;;  %2621 = vrcp.f32 %v1631_v32  ;;  %v1641_v44 = vadd.f32 1.0, %v2594_v52 }
 0x2e1   : > { %v2598_v63 = vpop.eup %2597  ;;  %2623 = vrcp.f32 %v1632_v7  ;;  %v1642_v36 = vadd.f32 1.0, %v2596_v16 }
 0x2e2   : > { %v2600_v25 = vpop.eup %2599  ;;  %2625 = vrcp.f32 %v1633_v19  ;;  %v1720_v40 = vrot.slane %v2598_v63, %v4119_v10 }
 0x2e3   : > { %v2602_v34 = vpop.eup %2601  ;;  %2627 = vrcp.f32 %v1634_v58  ;;  %v1725_v57 = vrot.slane %v2600_v25, %v4121_v42 }
 0x2e4   : > { %v2604_v39 = vpop.eup %2603  ;;  %2629 = vrcp.f32 %v1635_v50  ;;  %v1732_v4 = vrot.slane %v2602_v34, %v4123_v1 }
 0x2e5   : > { %v2606_v35 = vpop.eup %2605  ;;  %2631 = vrcp.f32 %v1636_v29  ;;  %v1727_v38 = vsel %vm1726_vm13, %v1725_v57, %v1720_v40  ;;  %v1738_v59 = vrot.slane %v2604_v39, %v4119_v10 }
 0x2e6   : > { %v2608_v2 = vpop.eup %2607  ;;  %2633 = vrcp.f32 %v1637_v3  ;;  %v1742_v31 = vrot.slane %v2606_v35, %v4121_v42  ;;  %v1734_v43 = vsel %vm1733_vm14, %v1732_v4, %v1727_v38 }
 0x2e7   : > { %v2610_v21 = vpop.eup %2609  ;;  %2635 = vrcp.f32 %v1638_v60  ;;  %v1747_v23 = vrot.slane %v2608_v2, %v4123_v1 }
 0x2e8   : > { %v2612_v11 = vpop.eup %2611  ;;  %2637 = vrcp.f32 %v1639_v24  ;;  %v1743_v6 = vsel %vm1726_vm13, %v1742_v31, %v1738_v59  ;;  %v1752_v12 = vrot.slane %v2610_v21, %v4119_v10 }
 0x2e9   : > { %v2614_v9 = vpop.eup %2613  ;;  %2639 = vrcp.f32 %v1640_v28  ;;  %v1748_v0 = vsel %vm1733_vm14, %v1747_v23, %v1743_v6  ;;  %v1756_v14 = vrot.slane %v2612_v11, %v4121_v42 }
 0x2ea   : > { %v2616_v20 = vpop.eup %2615  ;;  %2641 = vrcp.f32 %v1641_v44  ;;  %v1761_v8 = vrot.slane %v2614_v9, %v4123_v1  ;;  %v1834_v26 = vsel %vm1833_vm15, %v1748_v0, %v1734_v43 }
 0x2eb   : > { %v2618_v33 = vpop.eup %2617  ;;  %2643 = vrcp.f32 %v1642_v36  ;;  %v1757_v49 = vsel %vm1726_vm13, %v1756_v14, %v1752_v12  ;;  %v1766_v17 = vrot.slane %v2616_v20, %v4119_v10 }
 0x2ec   : > { %v2620_v55 = vpop.eup %2619  ;;  %v1762_v37 = vsel %vm1733_vm14, %v1761_v8, %v1757_v49  ;;  %v1770_v13 = vrot.slane %v2618_v33, %v4121_v42 }
 0x2ed   : > { %v2622_v54 = vpop.eup %2621  ;;  %v1775_v51 = vrot.slane %v2620_v55, %v4123_v1  ;;  %v1836_v47 = vsel %vm1835_vm0, %v1762_v37, %v1834_v26 }
 0x2ee   : > { %v2624_v5 = vpop.eup %2623  ;;  %v1771_v18 = vsel %vm1726_vm13, %v1770_v13, %v1766_v17  ;;  %v1780_v15 = vrot.slane %v2622_v54, %v4119_v10 }
 0x2ef   : > { %v2626_v30 = vpop.eup %2625  ;;  %v1776_v22 = vsel %vm1733_vm14, %v1775_v51, %v1771_v18  ;;  %v1784_v45 = vrot.slane %v2624_v5, %v4121_v42 }
 0x2f0   : > { %v2628_v48 = vpop.eup %2627  ;;  %v1789_v41 = vrot.slane %v2626_v30, %v4123_v1  ;;  %v1838_v46 = vsel %vm1837_vm1, %v1776_v22, %v1836_v47 }
 0x2f1   : > { %v2630_v53 = vpop.eup %2629  ;;  %v1785_v27 = vsel %vm1726_vm13, %v1784_v45, %v1780_v15  ;;  %v1794_v32 = vrot.slane %v2628_v48, %v4119_v10 }
 0x2f2   : > { %v2632_v62 = vpop.eup %2631  ;;  %v1790_v61 = vsel %vm1733_vm14, %v1789_v41, %v1785_v27  ;;  %v1798_v7 = vrot.slane %v2630_v53, %v4121_v42 }
 0x2f3   : > { %v2634_v56 = vpop.eup %2633  ;;  %v1803_v19 = vrot.slane %v2632_v62, %v4123_v1  ;;  %v1840_v52 = vsel %vm1839_vm2, %v1790_v61, %v1838_v46 }
 0x2f4   : > { %v2636_v58 = vpop.eup %2635  ;;  %v1799_v16 = vsel %vm1726_vm13, %v1798_v7, %v1794_v32  ;;  %v1808_v50 = vrot.slane %v2634_v56, %v4119_v10 }
 0x2f5   : > { %v2638_v63 = vpop.eup %2637  ;;  %v1804_v29 = vsel %vm1733_vm14, %v1803_v19, %v1799_v16  ;;  %v1812_v25 = vrot.slane %v2636_v58, %v4121_v42 }
 0x2f6   : > { %v2640_v3 = vpop.eup %2639  ;;  %v1817_v40 = vrot.slane %v2638_v63, %v4123_v1  ;;  %v1842_v34 = vsel %vm1841_vm3, %v1804_v29, %v1840_v52 }
 0x2f7   : > { %v2642_v60 = vpop.eup %2641  ;;  %v1813_v57 = vsel %vm1726_vm13, %v1812_v25, %v1808_v50  ;;  %v1822_v39 = vrot.slane %v2640_v3, %v4119_v10 }
 0x2f8   : > { %v2644_v24 = vpop.eup %2643  ;;  %v1818_v4 = vsel %vm1733_vm14, %v1817_v40, %v1813_v57  ;;  %v1826_v35 = vrot.slane %v2642_v60, %v4121_v42 }
 0x2f9   : > { %v1831_v28 = vrot.slane %v2644_v24, %v4123_v1  ;;  %v1844_v38 = vsel %vm1843_vm4, %v1818_v4, %v1842_v34 }
 0x2fa   : > { %v1827_v59 = vsel %vm1726_vm13, %v1826_v35, %v1822_v39 }
 0x2fb   : > { %v1832_v2 = vsel %vm1733_vm14, %v1831_v28, %v1827_v59 }
 0x2fc   : > { %v1846_v10 = vsel %vm1845_vm5, %v1832_v2, %v1844_v38 }
 0x2fd   : > { %1848 = vst.msk [vmem:[%s219_s17] sm:$0xff] %vm1163_vm10, %v1846_v10 }
 0x2fe   : > { %2673 = shalt.err (!%p2670_p3)
}
 0x2ff   : > { %s2674_s9 = scalar_lea.hbm %s4176_s26, 128  ;;  %s2678_s12 = scalar_lea.hbm %s4219_s5, 512 }
 0x300   : > { %p2675_p4 = scmp.ne.s32.totalorder %s4176_s26, %s2674_s9  ;;  %p2679_p9 = scmp.lt.s32.totalorder %s4176_s26, %s4219_s5 }
 0x301   : > { %p2680_p10 = scmp.lt.s32.totalorder %s2678_s12, %s2674_s9 }
 0x302   : > { %p2676_p7 = pnand %p2675_p4, %p2804_p5 }
 0x303   : > { %p2681_p11 = por %p2680_p10, %p2679_p9 }
 0x304   : > { %p2677_p8 = pneg %p2676_p7 }
 0x306   : > { %p2682_p12 = pnand %p2681_p11, %p2677_p8 }
 0x308   : > { %2685 = shalt.err (!%p2682_p12)
}
 0x309   : > { %2018 = dma.vmem_to_hbm [thread:$0]  (%p2804_p5), %s1864_s18, 128, %s4176_s26, %s1850_s4  }
 0x30a PF: > { %p2024_p13 = scmp.ge.s32.totalorder %s2720_s23, 2  ;;  %s1875_s15 = sand.u32 1, %s2708_s20  }
 0x30b   : > { %s1876_s16 = scalar_lea.sflag [#allocation4], %s1875_s15 }
 0x30c   : > { %p2021_p0 = pnand %p2024_p13, %p2808_p6 }
 0x30e   : > { %p2022_p1 = pneg %p2021_p0 }
 0x310   : > { %2703 = dma.done.wait (%p2022_p1), %s1876_s16, 128  }
 0x311   : > { %2705 = vsyncadd (%p2022_p1), %s1876_s16, 4294967168  ;;  %p17_p2 = scmp.ge.s32.totalorder %s2791_s25, 6   ;;  %s4358_s20 = smov %s2712_s21 }
 0x312   : > { %s4359_s21 = smov %s2716_s22  ;;  %s4360_s22 = smov %s2802_s28 }
 0x313   : > { %s4361_s23 = smov %s2791_s25  ;;  %19 = sbr.rel (!%p17_p2) target bundleno = 6 (0x6), region = 75 }
 0x318   :  { %1881 = vsyncpa [#allocation4], 1 }
 0x319   :  { %1883 = vsyncpa [#allocation4 + $0x1], 1 }

</bundles_post_ra>
